<compile_context>
chip_gen: v7x
topology: tpu7x:2x2x1
jax: 0.10.0
libtpu: 0.0.40
codegen_flags: <defaults>
</compile_context>

<pallas_src>
import functools

import jax
import jax.numpy as jnp
from jax.experimental import pallas as pl
from jax.experimental.pallas import tpu as pltpu


def autoencoder_kernel(x_ref, w1_ref, b1_ref, w2_ref, b2_ref,
                       w3_ref, b3_ref, w4_ref, b4_ref, o_ref):
    bf16 = jnp.bfloat16
    # --- encoder ---
    x = x_ref[...].astype(bf16)                                    # (TM, D), no-op if bf16 in
    h1 = jnp.dot(x, w1_ref[...], preferred_element_type=jnp.float32) + b1_ref[...]
    h1 = jnp.maximum(h1, 0.0)                                      # ReLU (f32)
    z = jnp.dot(h1.astype(bf16), w2_ref[...],
                preferred_element_type=jnp.float32) + b2_ref[...]
    # --- decoder ---
    h2 = jnp.dot(z.astype(bf16), w3_ref[...],
                 preferred_element_type=jnp.float32) + b3_ref[...]
    h2 = jnp.maximum(h2, 0.0)                                      # ReLU (f32)
    y = jnp.dot(h2.astype(bf16), w4_ref[...],
                preferred_element_type=jnp.float32) + b4_ref[...]
    # Sigmoid: exp (EUP) + approx reciprocal (EUP) -> no f32 divide on the VPU.
    e = jnp.exp(-y)
    sig = pl.reciprocal(1.0 + e, approx=True)
    o_ref[...] = sig.astype(o_ref.dtype)                           # bf16 writeback by default


@functools.partial(jax.jit, static_argnames=("tm", "out_dtype"))
def autoencoder_forward(x_nchw, params, *, tm=512, out_dtype=jnp.bfloat16):
    """x_nchw: (N, C, H, W), f32 or bf16. Returns reconstruction (N, C, H, W).

    tm: max rows per grid step (rounded down to a multiple of 8).
    out_dtype: output dtype; bf16 by default to halve output HBM traffic.
    """
    n, c, h, w = x_nchw.shape
    d = c * h * w
    x_flat = x_nchw.reshape(n, d)          # keep caller dtype (bf16 halves input DMA)

    w1, b1, w2, b2, w3, b3, w4, b4 = params
    # bf16 weights: halve the dominant weight HBM traffic, native MXU bf16 rate.
    w1, w2, w3, w4 = (wi.astype(jnp.bfloat16) for wi in (w1, w2, w3, w4))
    b1, b2, b3, b4 = (bi.astype(jnp.float32) for bi in (b1, b2, b3, b4))

    # Row tile: multiple of 8 (sublane), large by default (HBM roofline), but
    # capped so large batches keep >= ~4 grid steps (2 TCs on v7x + pipelining).
    tm = max(8, (int(tm) // 8) * 8)
    steps_cap = max(8, ((pl.cdiv(n, 4) + 7) // 8) * 8)
    tm_eff = min(tm, steps_cap)
    if n <= tm_eff:
        tm_eff = n                         # single full-extent block (covers n < 8 too)
    grid = (pl.cdiv(n, tm_eff),)
    # No input padding / output slicing: the last ragged block's OOB output
    # writes are masked by Pallas and rows are independent.

    # x / out march over the batch; weights & biases map to block (0, 0) every
    # iteration -> fetched once, VMEM-resident for the whole grid.
    resident = lambda a: pl.BlockSpec(a.shape, lambda i: (0, 0))

    out = pl.pallas_call(
        autoencoder_kernel,
        out_shape=jax.ShapeDtypeStruct((n, d), out_dtype),
        grid=grid,
        in_specs=[
            pl.BlockSpec((tm_eff, d), lambda i: (i, 0)),   # x tile
            resident(w1), resident(b1),
            resident(w2), resident(b2),
            resident(w3), resident(b3),
            resident(w4), resident(b4),
        ],
        out_specs=pl.BlockSpec((tm_eff, d), lambda i: (i, 0)),
        compiler_params=pltpu.CompilerParams(
            dimension_semantics=("parallel",),
            vmem_limit_bytes=64 * 1024 * 1024),   # v5e scoped default (16 MiB) is too low at tm>=512
    )(x_flat, w1, b1, w2, b2, w3, b3, w4, b4)

    return out.reshape(n, c, h, w)


def init_params(key, in_dim, hidden=256, latent=64):
    """Deterministic init mimicking nn.Linear (uniform +/- 1/sqrt(fan_in))."""
    def linear(k, fan_in, fan_out):
        kw, kb = jax.random.split(k)
        bound = 1.0 / jnp.sqrt(fan_in)
        w = jax.random.uniform(kw, (fan_in, fan_out), jnp.float32, -bound, bound)
        b = jax.random.uniform(kb, (1, fan_out), jnp.float32, -bound, bound)
        return w, b

    k1, k2, k3, k4 = jax.random.split(key, 4)
    w1, b1 = linear(k1, in_dim, hidden)    # encoder layer 1
    w2, b2 = linear(k2, hidden, latent)    # encoder layer 2 (bottleneck)
    w3, b3 = linear(k3, latent, hidden)    # decoder layer 1
    w4, b4 = linear(k4, hidden, in_dim)    # decoder layer 2
    return (w1, b1, w2, b2, w3, b3, w4, b4)


def _ref_forward(x_nchw, params, use_bf16_operands):
    """Pure-JAX reference of the same forward pass (exact sigmoid, f32 output)."""
    n = x_nchw.shape[0]
    w1, b1, w2, b2, w3, b3, w4, b4 = params
    cast = (lambda a: a.astype(jnp.bfloat16)) if use_bf16_operands else (lambda a: a)
    xf = x_nchw.reshape(n, -1).astype(jnp.float32)
    h1 = jnp.maximum(
        jnp.dot(cast(xf), cast(w1), preferred_element_type=jnp.float32) + b1, 0.0)
    z = jnp.dot(cast(h1), cast(w2), preferred_element_type=jnp.float32) + b2
    h2 = jnp.maximum(
        jnp.dot(cast(z), cast(w3), preferred_element_type=jnp.float32) + b3, 0.0)
    y = jnp.dot(cast(h2), cast(w4), preferred_element_type=jnp.float32) + b4
    return jax.nn.sigmoid(y).reshape(x_nchw.shape)


if __name__ == "__main__":
    key = jax.random.PRNGKey(0)
    kx, kp = jax.random.split(key)

    # Small NCHW input consistent with an image autoencoder.
    N, C, H, W = 2, 4, 16, 16
    x = jax.random.normal(kx, (N, C, H, W), dtype=jnp.float32)

    params = init_params(kp, in_dim=C * H * W, hidden=256, latent=64)

    x_recon = autoencoder_forward(x, params)
    jax.block_until_ready(x_recon)
    assert x_recon.shape == (N, C, H, W)
    assert x_recon.dtype == jnp.bfloat16

    x_recon_f32 = x_recon.astype(jnp.float32)
    # Check vs. a reference using the same bf16 operands / f32 accumulate
    # (tolerance covers bf16 output quantization + approx-reciprocal sigmoid).
    ref_bf16 = _ref_forward(x, params, use_bf16_operands=True)
    err = float(jnp.max(jnp.abs(x_recon_f32 - ref_bf16)))
    assert err < 2e-2, err
    # Loose sanity check vs. a full-f32 reference (bounds total quantization error).
    ref_f32 = _ref_forward(x, params, use_bf16_operands=False)
    err32 = float(jnp.max(jnp.abs(x_recon_f32 - ref_f32)))
    assert err32 < 6e-2, err32

    print("KERNEL_OK")
</pallas_src>

<mosaic_0001>
module attributes {stable_mosaic.version = 11 : i64} {
  func.func @autoencoder_kernel(%arg0: i32, %arg1: memref<2x1024xf32, #tpu.memory_space<vmem>>, %arg2: memref<1024x256xbf16, #tpu.memory_space<vmem>>, %arg3: memref<1x256xf32, #tpu.memory_space<vmem>>, %arg4: memref<256x64xbf16, #tpu.memory_space<vmem>>, %arg5: memref<1x64xf32, #tpu.memory_space<vmem>>, %arg6: memref<64x256xbf16, #tpu.memory_space<vmem>>, %arg7: memref<1x256xf32, #tpu.memory_space<vmem>>, %arg8: memref<256x1024xbf16, #tpu.memory_space<vmem>>, %arg9: memref<1x1024xf32, #tpu.memory_space<vmem>>, %arg10: memref<2x1024xbf16, #tpu.memory_space<vmem>>) attributes {dimension_semantics = [#tpu.dimension_semantics<parallel>], iteration_bounds = array<i64: 1>, scalar_prefetch = 0 : i64, scratch_operands = 0 : i64, tpu.core_type = #tpu.core_type<tc>, window_params = [{transform_indices = @transform_0, window_bounds = array<i64: 2, 1024>}, {pipeline_mode = #tpu.pipeline_mode<synchronous>, transform_indices = @transform_1, window_bounds = array<i64: 1024, 256>}, {pipeline_mode = #tpu.pipeline_mode<synchronous>, transform_indices = @transform_2, window_bounds = array<i64: 1, 256>}, {pipeline_mode = #tpu.pipeline_mode<synchronous>, transform_indices = @transform_3, window_bounds = array<i64: 256, 64>}, {pipeline_mode = #tpu.pipeline_mode<synchronous>, transform_indices = @transform_4, window_bounds = array<i64: 1, 64>}, {pipeline_mode = #tpu.pipeline_mode<synchronous>, transform_indices = @transform_5, window_bounds = array<i64: 64, 256>}, {pipeline_mode = #tpu.pipeline_mode<synchronous>, transform_indices = @transform_6, window_bounds = array<i64: 1, 256>}, {pipeline_mode = #tpu.pipeline_mode<synchronous>, transform_indices = @transform_7, window_bounds = array<i64: 256, 1024>}, {pipeline_mode = #tpu.pipeline_mode<synchronous>, transform_indices = @transform_8, window_bounds = array<i64: 1, 1024>}, {transform_indices = @transform_9, window_bounds = array<i64: 2, 1024>}]} {
    %c0 = arith.constant 0 : index
    %c0_0 = arith.constant 0 : index
    %0 = vector.load %arg1[%c0, %c0_0] : memref<2x1024xf32, #tpu.memory_space<vmem>>, vector<2x1024xf32>
    %1 = arith.truncf %0 : vector<2x1024xf32> to vector<2x1024xbf16>
    %c0_1 = arith.constant 0 : index
    %c0_2 = arith.constant 0 : index
    %2 = vector.load %arg2[%c0_1, %c0_2] : memref<1024x256xbf16, #tpu.memory_space<vmem>>, vector<1024x256xbf16>
    %cst = arith.constant dense<0.000000e+00> : vector<2x256xf32>
    %3 = tpu.matmul %1, %2, %cst {dimension_numbers = #tpu.dot_dimension_numbers<[1], [0], [0], [1], [0, 0, 1, 1], [], []>} : vector<2x1024xbf16>, vector<1024x256xbf16>, vector<2x256xf32> -> vector<2x256xf32>
    %c0_3 = arith.constant 0 : index
    %c0_4 = arith.constant 0 : index
    %4 = vector.load %arg3[%c0_3, %c0_4] : memref<1x256xf32, #tpu.memory_space<vmem>>, vector<1x256xf32>
    %5 = vector.broadcast %4 : vector<1x256xf32> to vector<2x256xf32>
    %6 = arith.addf %3, %5 : vector<2x256xf32>
    %cst_5 = arith.constant 0.000000e+00 : f32
    %7 = vector.broadcast %cst_5 : f32 to vector<2x256xf32>
    %8 = arith.maximumf %6, %7 : vector<2x256xf32>
    %9 = arith.truncf %8 : vector<2x256xf32> to vector<2x256xbf16>
    %c0_6 = arith.constant 0 : index
    %c0_7 = arith.constant 0 : index
    %10 = vector.load %arg4[%c0_6, %c0_7] : memref<256x64xbf16, #tpu.memory_space<vmem>>, vector<256x64xbf16>
    %cst_8 = arith.constant dense<0.000000e+00> : vector<2x64xf32>
    %11 = tpu.matmul %9, %10, %cst_8 {dimension_numbers = #tpu.dot_dimension_numbers<[1], [0], [0], [1], [0, 0, 1, 1], [], []>} : vector<2x256xbf16>, vector<256x64xbf16>, vector<2x64xf32> -> vector<2x64xf32>
    %c0_9 = arith.constant 0 : index
    %c0_10 = arith.constant 0 : index
    %12 = vector.load %arg5[%c0_9, %c0_10] : memref<1x64xf32, #tpu.memory_space<vmem>>, vector<1x64xf32>
    %13 = vector.broadcast %12 : vector<1x64xf32> to vector<2x64xf32>
    %14 = arith.addf %11, %13 : vector<2x64xf32>
    %15 = arith.truncf %14 : vector<2x64xf32> to vector<2x64xbf16>
    %c0_11 = arith.constant 0 : index
    %c0_12 = arith.constant 0 : index
    %16 = vector.load %arg6[%c0_11, %c0_12] : memref<64x256xbf16, #tpu.memory_space<vmem>>, vector<64x256xbf16>
    %cst_13 = arith.constant dense<0.000000e+00> : vector<2x256xf32>
    %17 = tpu.matmul %15, %16, %cst_13 {dimension_numbers = #tpu.dot_dimension_numbers<[1], [0], [0], [1], [0, 0, 1, 1], [], []>} : vector<2x64xbf16>, vector<64x256xbf16>, vector<2x256xf32> -> vector<2x256xf32>
    %c0_14 = arith.constant 0 : index
    %c0_15 = arith.constant 0 : index
    %18 = vector.load %arg7[%c0_14, %c0_15] : memref<1x256xf32, #tpu.memory_space<vmem>>, vector<1x256xf32>
    %19 = vector.broadcast %18 : vector<1x256xf32> to vector<2x256xf32>
    %20 = arith.addf %17, %19 : vector<2x256xf32>
    %cst_16 = arith.constant 0.000000e+00 : f32
    %21 = vector.broadcast %cst_16 : f32 to vector<2x256xf32>
    %22 = arith.maximumf %20, %21 : vector<2x256xf32>
    %23 = arith.truncf %22 : vector<2x256xf32> to vector<2x256xbf16>
    %c0_17 = arith.constant 0 : index
    %c0_18 = arith.constant 0 : index
    %24 = vector.load %arg8[%c0_17, %c0_18] : memref<256x1024xbf16, #tpu.memory_space<vmem>>, vector<256x1024xbf16>
    %cst_19 = arith.constant dense<0.000000e+00> : vector<2x1024xf32>
    %25 = tpu.matmul %23, %24, %cst_19 {dimension_numbers = #tpu.dot_dimension_numbers<[1], [0], [0], [1], [0, 0, 1, 1], [], []>} : vector<2x256xbf16>, vector<256x1024xbf16>, vector<2x1024xf32> -> vector<2x1024xf32>
    %c0_20 = arith.constant 0 : index
    %c0_21 = arith.constant 0 : index
    %26 = vector.load %arg9[%c0_20, %c0_21] : memref<1x1024xf32, #tpu.memory_space<vmem>>, vector<1x1024xf32>
    %27 = vector.broadcast %26 : vector<1x1024xf32> to vector<2x1024xf32>
    %28 = arith.addf %25, %27 : vector<2x1024xf32>
    %cst_22 = arith.constant 0.000000e+00 : f32
    %29 = vector.broadcast %cst_22 : f32 to vector<2x1024xf32>
    %30 = arith.subf %29, %28 : vector<2x1024xf32>
    %31 = math.exp %30 : vector<2x1024xf32>
    %cst_23 = arith.constant 1.000000e+00 : f32
    %32 = vector.broadcast %cst_23 : f32 to vector<2x1024xf32>
    %33 = arith.addf %32, %31 : vector<2x1024xf32>
    %34 = tpu.reciprocal %33 {approx = true} : vector<2x1024xf32> -> vector<2x1024xf32>
    %35 = arith.truncf %34 : vector<2x1024xf32> to vector<2x1024xbf16>
    %c0_24 = arith.constant 0 : index
    %c0_25 = arith.constant 0 : index
    %36 = vector.load %arg10[%c0_24, %c0_25] : memref<2x1024xbf16, #tpu.memory_space<vmem>>, vector<2x1024xbf16>
    tpu.vector_store %arg10[%c0_24, %c0_25], %35 {strides = array<i32>} : memref<2x1024xbf16, #tpu.memory_space<vmem>>, vector<2x1024xbf16>,
    return
  }
  func.func @transform_0(%arg0: i32) -> (i32, i32) {
    %c0_i32 = arith.constant 0 : i32
    %c0_i32_0 = arith.constant 0 : i32
    return %arg0, %c0_i32 : i32, i32
  }
  func.func @transform_1(%arg0: i32) -> (i32, i32) {
    %c0_i32 = arith.constant 0 : i32
    %c0_i32_0 = arith.constant 0 : i32
    %c0_i32_1 = arith.constant 0 : i32
    return %c0_i32, %c0_i32_0 : i32, i32
  }
  func.func @transform_2(%arg0: i32) -> (i32, i32) {
    %c0_i32 = arith.constant 0 : i32
    %c0_i32_0 = arith.constant 0 : i32
    %c0_i32_1 = arith.constant 0 : i32
    return %c0_i32, %c0_i32_0 : i32, i32
  }
  func.func @transform_3(%arg0: i32) -> (i32, i32) {
    %c0_i32 = arith.constant 0 : i32
    %c0_i32_0 = arith.constant 0 : i32
    %c0_i32_1 = arith.constant 0 : i32
    return %c0_i32, %c0_i32_0 : i32, i32
  }
  func.func @transform_4(%arg0: i32) -> (i32, i32) {
    %c0_i32 = arith.constant 0 : i32
    %c0_i32_0 = arith.constant 0 : i32
    %c0_i32_1 = arith.constant 0 : i32
    return %c0_i32, %c0_i32_0 : i32, i32
  }
  func.func @transform_5(%arg0: i32) -> (i32, i32) {
    %c0_i32 = arith.constant 0 : i32
    %c0_i32_0 = arith.constant 0 : i32
    %c0_i32_1 = arith.constant 0 : i32
    return %c0_i32, %c0_i32_0 : i32, i32
  }
  func.func @transform_6(%arg0: i32) -> (i32, i32) {
    %c0_i32 = arith.constant 0 : i32
    %c0_i32_0 = arith.constant 0 : i32
    %c0_i32_1 = arith.constant 0 : i32
    return %c0_i32, %c0_i32_0 : i32, i32
  }
  func.func @transform_7(%arg0: i32) -> (i32, i32) {
    %c0_i32 = arith.constant 0 : i32
    %c0_i32_0 = arith.constant 0 : i32
    %c0_i32_1 = arith.constant 0 : i32
    return %c0_i32, %c0_i32_0 : i32, i32
  }
  func.func @transform_8(%arg0: i32) -> (i32, i32) {
    %c0_i32 = arith.constant 0 : i32
    %c0_i32_0 = arith.constant 0 : i32
    %c0_i32_1 = arith.constant 0 : i32
    return %c0_i32, %c0_i32_0 : i32, i32
  }
  func.func @transform_9(%arg0: i32) -> (i32, i32) {
    %c0_i32 = arith.constant 0 : i32
    %c0_i32_0 = arith.constant 0 : i32
    return %arg0, %c0_i32 : i32, i32
  }
}

</mosaic_0001>

<bundles_post_ra>
// kernel: autoencoder_forward.1
= control target key start
LH: loop header
LB: loop body
LE: loop exit
PB: predicated region body
PF: predicated region fallthrough
CT: control target
= control target key end

     0   :  { %14 = vsyncpa [#allocation3], 0  ;;  %s3635_s0 = inlined_call_operand.hbm [shape: f32[2,1024], index: 0, kind: input, shape index: {}]   ;;  %s3636_s1 = inlined_call_operand.hbm [shape: bf16[1024,256], index: 1, kind: input, shape index: {}]   ;;  %s3637_s2 = inlined_call_operand.hbm [shape: f32[1,256], index: 2, kind: input, shape index: {}]   ;;  %s3638_s3 = inlined_call_operand.hbm [shape: bf16[256,64], index: 3, kind: input, shape index: {}]   ;;  %s3639_s4 = inlined_call_operand.hbm [shape: f32[1,64], index: 4, kind: input, shape index: {}]   ;;  %s3640_s5 = inlined_call_operand.hbm [shape: bf16[64,256], index: 5, kind: input, shape index: {}]   ;;  %s3641_s6 = inlined_call_operand.hbm [shape: f32[1,256], index: 6, kind: input, shape index: {}]   ;;  %s3642_s7 = inlined_call_operand.hbm [shape: bf16[256,1024], index: 7, kind: input, shape index: {}]   ;;  %s3643_s8 = inlined_call_operand.hbm [shape: f32[1,1024], index: 8, kind: input, shape index: {}]   ;;  %s3644_s9 = inlined_call_operand.hbm [shape: bf16[2,1024], index: 9, kind: output, shape index: {}]  }
   0x1   :  { %15 = vsyncpa [#allocation6], 0 }
   0x2   :  { %16 = vsyncpa [#allocation9], 0 }
   0x3   :  { %17 = vsyncpa [#allocation12], 0 }
   0x4   :  { %18 = vsyncpa [#allocation15], 0 }
   0x5   :  { %19 = vsyncpa [#allocation4], 0  ;;  %s3360_s30 = smov [#allocation5]   ;;  %s3128_s13 = scalar_lea.hbm %s3636_s1, 16384 }
   0x6   :  { %s35_s10 = sshll.u32 %s3360_s30, 4  ;;  %p3129_p0 = scmp.ne.s32.totalorder %s3636_s1, %s3128_s13  ;;  %s36_s10 = int_to_ptr.vmem [resolvable:$true] %s35_s10 }
   0x7   :  { %p3132_p1 = scmp.lt.u32.totalorder %s3128_s13, %s3636_s1 }
   0x9   :  { %p3134_p2 = pnand %p3132_p1, %p3129_p0 }
   0xb   :  { %3137 = shalt.err (!%p3134_p2)
}
   0xc   :  { %s3138_s18 = scalar_lea.vmem %s36_s10, 16384  ;;  %p3143_p4 = scmp.lt.s32.totalorder %s36_s10, %s36_s10 }
   0xd   :  { %p3139_p3 = scmp.ne.s32.totalorder %s36_s10, %s3138_s18  ;;  %p3144_p5 = scmp.lt.s32.totalorder %s3138_s18, %s3138_s18 }
   0xf   :  { %p3145_p6 = por %p3144_p5, %p3143_p4 }
  0x11   :  { %p3146_p7 = pnand %p3145_p6, %p3139_p3 }
  0x13   :  { %3149 = shalt.err (!%p3146_p7)
}
  0x14   :  { %s3361_s19 = smov 128   ;;  %s3362_s20 = smov 8  }
  0x15   :  { %41 = dma.hbm_to_vmem [thread:$0]  %s3636_s1, 16384, %s36_s10, [#allocation6], %s3361_s19, %s3361_s19, %s3362_s20  }
  0x16   :  { %s3363_s23 = smov [#allocation8]   ;;  %s3150_s27 = scalar_lea.hbm %s3638_s3, 2048 }
  0x17   :  { %s57_s24 = sshll.u32 %s3363_s23, 4  ;;  %p3151_p8 = scmp.ne.s32.totalorder %s3638_s3, %s3150_s27  ;;  %s58_s24 = int_to_ptr.vmem [resolvable:$true] %s57_s24 }
  0x18   :  { %p3154_p9 = scmp.lt.u32.totalorder %s3150_s27, %s3638_s3 }
  0x1a   :  { %p3156_p10 = pnand %p3154_p9, %p3151_p8 }
  0x1c   :  { %3159 = shalt.err (!%p3156_p10)
}
  0x1d   :  { %s3160_s12 = scalar_lea.vmem %s58_s24, 2048  ;;  %p3165_p12 = scmp.lt.s32.totalorder %s58_s24, %s58_s24 }
  0x1e   :  { %p3161_p11 = scmp.ne.s32.totalorder %s58_s24, %s3160_s12  ;;  %p3166_p13 = scmp.lt.s32.totalorder %s3160_s12, %s3160_s12 }
  0x20   :  { %p3167_p0 = por %p3166_p13, %p3165_p12 }
  0x22   :  { %p3168_p1 = pnand %p3167_p0, %p3161_p11 }
  0x24   :  { %3171 = shalt.err (!%p3168_p1)
}
  0x25   :  { %s3364_s1 = smov 64   ;;  %s3365_s10 = smov 4  }
  0x26   :  { %63 = dma.hbm_to_vmem [thread:$0]  %s3638_s3, 2048, %s58_s24, [#allocation9], %s3364_s1, %s3364_s1, %s3365_s10  }
  0x27   :  { %s3366_s15 = smov [#allocation11]   ;;  %s3367_s17 = smov [#allocation14]  }
  0x28   :  { %s79_s16 = sshll.u32 %s3366_s15, 4  ;;  %s101_s18 = sshll.u32 %s3367_s17, 4  ;;  %s80_s16 = int_to_ptr.vmem [resolvable:$true] %s79_s16  ;;  %s3456_s18 = int_to_ptr.vmem [resolvable:$true] %s101_s18 }
  0x29   :  { %s3172_s23 = scalar_lea.hbm %s3640_s5, 1024 }
  0x2a   :  { %p3173_p2 = scmp.ne.s32.totalorder %s3640_s5, %s3172_s23  ;;  %p3176_p3 = scmp.lt.u32.totalorder %s3172_s23, %s3640_s5 }
  0x2c   :  { %p3178_p4 = pnand %p3176_p3, %p3173_p2 }
  0x2e   :  { %3181 = shalt.err (!%p3178_p4)
}
  0x2f   :  { %s3182_s3 = scalar_lea.vmem %s80_s16, 1024  ;;  %p3187_p6 = scmp.lt.s32.totalorder %s80_s16, %s80_s16 }
  0x30   :  { %p3183_p5 = scmp.ne.s32.totalorder %s80_s16, %s3182_s3  ;;  %p3188_p7 = scmp.lt.s32.totalorder %s3182_s3, %s3182_s3 }
  0x32   :  { %p3189_p8 = por %p3188_p7, %p3187_p6 }
  0x34   :  { %p3190_p9 = pnand %p3189_p8, %p3183_p5 }
  0x36   :  { %3193 = shalt.err (!%p3190_p9)
}
  0x37   :  { %85 = dma.hbm_to_vmem [thread:$0]  %s3640_s5, 1024, %s80_s16, [#allocation12], %s3361_s19, %s3361_s19, %s3362_s20  }
  0x38   :  { %s3194_s12 = scalar_lea.hbm %s3642_s7, 16384 }
  0x39   :  { %p3195_p10 = scmp.ne.s32.totalorder %s3642_s7, %s3194_s12  ;;  %p3198_p11 = scmp.lt.u32.totalorder %s3194_s12, %s3642_s7 }
  0x3b   :  { %p3200_p12 = pnand %p3198_p11, %p3195_p10 }
  0x3d   :  { %3203 = shalt.err (!%p3200_p12)
}
  0x3e   :  { %s3204_s15 = scalar_lea.vmem %s3456_s18, 16384  ;;  %p3209_p0 = scmp.lt.s32.totalorder %s3456_s18, %s3456_s18 }
  0x3f   :  { %p3205_p13 = scmp.ne.s32.totalorder %s3456_s18, %s3204_s15  ;;  %p3210_p1 = scmp.lt.s32.totalorder %s3204_s15, %s3204_s15 }
  0x41   :  { %p3211_p2 = por %p3210_p1, %p3209_p0 }
  0x43   :  { %p3212_p3 = pnand %p3211_p2, %p3205_p13 }
  0x45   :  { %3215 = shalt.err (!%p3212_p3)
}
  0x46   :  { %s3368_s5 = smov 512   ;;  %s3369_s19 = smov 32  }
  0x47   :  { %107 = dma.hbm_to_vmem [thread:$0]  %s3642_s7, 16384, %s3456_s18, [#allocation15], %s3368_s5, %s3368_s5, %s3369_s19  }
  0x48   :  { %s3370_s17 = smov [#allocation2]   ;;  %s3371_s22 = smov [#allocation7]  }
  0x49   :  { %s26_s21 = sshll.u32 %s3370_s17, 4  ;;  %s48_s23 = sshll.u32 %s3371_s22, 4  ;;  %s27_s21 = int_to_ptr.vmem [resolvable:$true] %s26_s21  ;;  %s49_s23 = int_to_ptr.vmem [resolvable:$true] %s48_s23 }
  0x4a   :  { %s3216_s27 = scalar_lea.hbm %s3635_s0, 256 }
  0x4b   :  { %p3217_p4 = scmp.ne.s32.totalorder %s3635_s0, %s3216_s27  ;;  %p3220_p5 = scmp.lt.u32.totalorder %s3216_s27, %s3635_s0 }
  0x4d   :  { %p3222_p6 = pnand %p3220_p5, %p3217_p4 }
  0x4f   :  { %3225 = shalt.err (!%p3222_p6)
}
  0x50   :  { %s3226_s7 = scalar_lea.vmem %s27_s21, 256  ;;  %p3231_p8 = scmp.lt.s32.totalorder %s27_s21, %s27_s21 }
  0x51   :  { %p3227_p7 = scmp.ne.s32.totalorder %s27_s21, %s3226_s7  ;;  %p3232_p9 = scmp.lt.s32.totalorder %s3226_s7, %s3226_s7 }
  0x53   :  { %p3233_p10 = por %p3232_p9, %p3231_p8 }
  0x55   :  { %p3234_p11 = pnand %p3233_p10, %p3227_p7 }
  0x57   :  { %3237 = shalt.err (!%p3234_p11)
}
  0x58   :  { %29 = dma.hbm_to_vmem [thread:$0]  %s3635_s0, 256, %s27_s21, [#allocation3]  }
  0x59   :  { %s3238_s1 = scalar_lea.hbm %s3637_s2, 32 }
  0x5a   :  { %p3239_p12 = scmp.ne.s32.totalorder %s3637_s2, %s3238_s1  ;;  %p3242_p13 = scmp.lt.u32.totalorder %s3238_s1, %s3637_s2 }
  0x5c   :  { %p3244_p0 = pnand %p3242_p13, %p3239_p12 }
  0x5e   :  { %3247 = shalt.err (!%p3244_p0)
}
  0x5f   :  { %s3248_s5 = scalar_lea.vmem %s49_s23, 32  ;;  %p3253_p2 = scmp.lt.s32.totalorder %s49_s23, %s49_s23 }
  0x60   :  { %p3249_p1 = scmp.ne.s32.totalorder %s49_s23, %s3248_s5  ;;  %p3254_p3 = scmp.lt.s32.totalorder %s3248_s5, %s3248_s5 }
  0x62   :  { %p3255_p4 = por %p3254_p3, %p3253_p2 }
  0x64   :  { %p3256_p5 = pnand %p3255_p4, %p3249_p1 }
  0x66   :  { %3259 = shalt.err (!%p3256_p5)
}
  0x67   :  { %51 = dma.hbm_to_vmem [thread:$0]  %s3637_s2, 32, %s49_s23, [#allocation6]  }
  0x68   :  { %s3372_s20 = smov [#allocation10]   ;;  %s3373_s17 = smov [#allocation13]  }
  0x69   :  { %s70_s16 = sshll.u32 %s3372_s20, 4  ;;  %s92_s21 = sshll.u32 %s3373_s17, 4  ;;  %s71_s16 = int_to_ptr.vmem [resolvable:$true] %s70_s16  ;;  %s93_s21 = int_to_ptr.vmem [resolvable:$true] %s92_s21 }
  0x6a   :  { %s3260_s26 = scalar_lea.hbm %s3639_s4, 16 }
  0x6b   :  { %p3261_p6 = scmp.ne.s32.totalorder %s3639_s4, %s3260_s26  ;;  %p3264_p7 = scmp.lt.u32.totalorder %s3260_s26, %s3639_s4 }
  0x6d   :  { %p3266_p8 = pnand %p3264_p7, %p3261_p6 }
  0x6f   :  { %3269 = shalt.err (!%p3266_p8)
}
  0x70   :  { %s3270_s2 = scalar_lea.vmem %s71_s16, 16  ;;  %s3274_s23 = scalar_lea.vmem %s71_s16, 32 }
  0x71   :  { %p3271_p9 = scmp.ne.s32.totalorder %s71_s16, %s3270_s2  ;;  %p3275_p10 = scmp.lt.s32.totalorder %s71_s16, %s71_s16 }
  0x72   :  { %p3276_p11 = scmp.lt.s32.totalorder %s3274_s23, %s3270_s2 }
  0x74   :  { %p3277_p12 = por %p3276_p11, %p3275_p10 }
  0x76   :  { %p3278_p13 = pnand %p3277_p12, %p3271_p9 }
  0x78   :  { %3281 = shalt.err (!%p3278_p13)
}
  0x79   :  { %73 = dma.hbm_to_vmem [thread:$0]  %s3639_s4, 16, %s71_s16, [#allocation9]  }
  0x7a   :  { %s3282_s11 = scalar_lea.hbm %s3641_s6, 32 }
  0x7b   :  { %p3283_p0 = scmp.ne.s32.totalorder %s3641_s6, %s3282_s11  ;;  %p3286_p1 = scmp.lt.u32.totalorder %s3282_s11, %s3641_s6 }
  0x7d   :  { %p3288_p2 = pnand %p3286_p1, %p3283_p0 }
  0x7f   :  { %3291 = shalt.err (!%p3288_p2)
}
  0x80   :  { %s3292_s14 = scalar_lea.vmem %s93_s21, 32  ;;  %p3297_p4 = scmp.lt.s32.totalorder %s93_s21, %s93_s21 }
  0x81   :  { %p3293_p3 = scmp.ne.s32.totalorder %s93_s21, %s3292_s14  ;;  %p3298_p5 = scmp.lt.s32.totalorder %s3292_s14, %s3292_s14 }
  0x83   :  { %p3299_p6 = por %p3298_p5, %p3297_p4 }
  0x85   :  { %p3300_p7 = pnand %p3299_p6, %p3293_p3 }
  0x87   :  { %3303 = shalt.err (!%p3300_p7)
}
  0x88   :  { %95 = dma.hbm_to_vmem [thread:$0]  %s3641_s6, 32, %s93_s21, [#allocation12]  }
  0x89   :  { %s3374_s5 = smov [#allocation16]   ;;  %s3304_s16 = scalar_lea.hbm %s3643_s8, 128 }
  0x8a   :  { %s114_s0 = sshll.u32 %s3374_s5, 4  ;;  %p3305_p8 = scmp.ne.s32.totalorder %s3643_s8, %s3304_s16  ;;  %s115_s0 = int_to_ptr.vmem [resolvable:$true] %s114_s0 }
  0x8b   :  { %p3308_p9 = scmp.lt.u32.totalorder %s3304_s16, %s3643_s8 }
  0x8d   :  { %p3310_p10 = pnand %p3308_p9, %p3305_p8 }
  0x8f   :  { %3313 = shalt.err (!%p3310_p10)
}
  0x90   :  { %s3314_s27 = scalar_lea.vmem %s115_s0, 128  ;;  %p3319_p12 = scmp.lt.s32.totalorder %s115_s0, %s115_s0 }
  0x91   :  { %p3315_p11 = scmp.ne.s32.totalorder %s115_s0, %s3314_s27  ;;  %p3320_p13 = scmp.lt.s32.totalorder %s3314_s27, %s3314_s27 }
  0x93   :  { %p3321_p0 = por %p3320_p13, %p3319_p12 }
  0x95   :  { %p3322_p1 = pnand %p3321_p0, %p3315_p11 }
  0x97   :  { %3325 = shalt.err (!%p3322_p1)
}
  0x98   :  { %117 = dma.hbm_to_vmem [thread:$0]  %s3643_s8, 128, %s115_s0, [#allocation15]  }
  0x99   :  { %3348 = dma.done.wait [#allocation3], 256  }
  0x9a   :  { %3349 = vsyncadd [#allocation3], 4294967040 }
  0x9b   :  { %3350 = dma.done.wait [#allocation6], 16416  }
  0x9c   :  { %3351 = vsyncadd [#allocation6], 4294950880 }
  0x9d   :  { %3352 = dma.done.wait [#allocation9], 2064  }
  0x9e   :  { %3353 = vsyncadd [#allocation9], 4294965232 }
  0x9f   :  { %3354 = dma.done.wait [#allocation12], 1056  }
  0xa0   :  { %3355 = vsyncadd [#allocation12], 4294966240 }
  0xa1   :  { %3356 = dma.done.wait [#allocation15], 16512  }
  0xa2   :  { %3357 = vsyncadd [#allocation15], 4294950784  ;;  %v2874_v0 = vld [vmem:[#allocation5 + $0x4] ss:$8 sps:$4 sm:$0xff]   ;;  %v2876_v1 = vld [vmem:[#allocation5] ss:$8 sps:$4 sm:$0xff]   ;;  %v154_v9 = vlaneseq }
  0xa3   :  { %980 = vmatprep.subr.bf16.mxu0 %v2874_v0  ;;  %v2877_v2 = vld [vmem:[#allocation5 + $0x14] ss:$8 sps:$4 sm:$0xff]   ;;  %v2879_v3 = vld [vmem:[#allocation5 + $0x10] ss:$8 sps:$4 sm:$0xff]   ;;  %v2880_v4 = vld [vmem:[#allocation5 + $0x24] ss:$8 sps:$4 sm:$0xff]  }
  0xa4   :  { %981 = vmatpush1.bf16.msra.mxu0 %v2876_v1  ;;  %v2882_v5 = vld [vmem:[#allocation5 + $0x20] ss:$8 sps:$4 sm:$0xff]   ;;  %v2883_v6 = vld [vmem:[#allocation5 + $0x34] ss:$8 sps:$4 sm:$0xff]   ;;  %v3375_v7 = vmov 1983009808  }
  0xa5   :  { %982 = vmatprep.subr.bf16.mxu0 %v2877_v2  ;;  %v152_v8 = vunpack.c.l.s4 %v3375_v7  ;;  %v2885_v10 = vld [vmem:[#allocation5 + $0x30] ss:$8 sps:$4 sm:$0xff]   ;;  %v2886_v11 = vld [vmem:[#allocation5 + $0x44] ss:$8 sps:$4 sm:$0xff]   ;;  %v3550_v13 = vshrl.u32 %v154_v9, 7  ;;  %vm1384_vm0 = vcmask 523264  }
  0xa6   :  { %v2888_v14 = vld [vmem:[#allocation5 + $0x40] ss:$8 sps:$4 sm:$0xff]   ;;  %v2889_v15 = vld [vmem:[#allocation5 + $0x54] ss:$8 sps:$4 sm:$0xff]   ;;  %v2891_v17 = vld [vmem:[#allocation5 + $0x50] ss:$8 sps:$4 sm:$0xff]  }
  0xa7   :  { %v153_v12 = vunpack.c.0.s8 %v152_v8  ;;  %v2892_v18 = vld [vmem:[#allocation5 + $0x64] ss:$8 sps:$4 sm:$0xff]   ;;  %v146_v19 = vld [vmem:[#allocation2] sm:$0xff]  ;;  %v2894_v21 = vld [vmem:[#allocation5 + $0x60] ss:$8 sps:$4 sm:$0xff]   ;;  %s3378_s8 = smov [#allocation17]  }
  0xa8   :  { %983 = vmatpush1.bf16.msra.mxu0 %v2879_v3  ;;  %v2895_v22 = vld [vmem:[#allocation5 + $0x74] ss:$8 sps:$4 sm:$0xff]   ;;  %v2897_v25 = vld [vmem:[#allocation5 + $0x70] ss:$8 sps:$4 sm:$0xff]   ;;  %v2898_v26 = vld [vmem:[#allocation5 + $0x84] ss:$8 sps:$4 sm:$0xff]   ;;  %v150_v38 = vcombine.high %v146_v19, %v146_v19 }
  0xa9   :  { %984 = vmatprep.subr.bf16.mxu0 %v2880_v4  ;;  %v3553_v16 = vsub.s32 %v153_v12, %v3550_v13  ;;  %v2900_v27 = vld [vmem:[#allocation5 + $0x80] ss:$8 sps:$4 sm:$0xff]   ;;  %v2901_v28 = vld [vmem:[#allocation5 + $0x94] ss:$8 sps:$4 sm:$0xff]   ;;  %v2903_v29 = vld [vmem:[#allocation5 + $0x90] ss:$8 sps:$4 sm:$0xff]  }
  0xaa   :  { %v2904_v30 = vld [vmem:[#allocation5 + $0xa4] ss:$8 sps:$4 sm:$0xff]   ;;  %v2906_v31 = vld [vmem:[#allocation5 + $0xa0] ss:$8 sps:$4 sm:$0xff]   ;;  %v2907_v32 = vld [vmem:[#allocation5 + $0xb4] ss:$8 sps:$4 sm:$0xff]  }
  0xab   :  { %v157_v20 = vrot.slane %v146_v19, %v3553_v16  ;;  %v2909_v33 = vld [vmem:[#allocation5 + $0xb0] ss:$8 sps:$4 sm:$0xff]   ;;  %v2910_v34 = vld [vmem:[#allocation5 + $0xc4] ss:$8 sps:$4 sm:$0xff]   ;;  %v2912_v35 = vld [vmem:[#allocation5 + $0xc0] ss:$8 sps:$4 sm:$0xff]   ;;  %v3557_v41 = vrot.slane %v150_v38, %v3553_v16 }
  0xac   :  { %985 = vmatpush1.bf16.msra.mxu0 %v2882_v5  ;;  %v2913_v36 = vld [vmem:[#allocation5 + $0xd4] ss:$8 sps:$4 sm:$0xff]   ;;  %v2915_v37 = vld [vmem:[#allocation5 + $0xd0] ss:$8 sps:$4 sm:$0xff]   ;;  %v2916_v39 = vld [vmem:[#allocation5 + $0xe4] ss:$8 sps:$4 sm:$0xff]  }
  0xad   :  { %986 = vmatprep.subr.bf16.mxu0 %v2883_v6  ;;  %v165_v23 = vcombine.high %v157_v20, %v157_v20  ;;  %v2918_v40 = vld [vmem:[#allocation5 + $0xe0] ss:$8 sps:$4 sm:$0xff]   ;;  %v2919_v42 = vld [vmem:[#allocation5 + $0xf4] ss:$8 sps:$4 sm:$0xff]   ;;  %v2921_v43 = vld [vmem:[#allocation5 + $0xf0] ss:$8 sps:$4 sm:$0xff]   ;;  %v166_v44 = vcombine.high %v3557_v41, %v3557_v41  ;;  %v192_v46 = vpack.c.bf16 %v157_v20, %v157_v20 }
  0xae   :  { %v2925_v45 = vld [vmem:[#allocation5 + $0x104] ss:$8 sps:$4 sm:$0xff]   ;;  %v2923_v47 = vld [vmem:[#allocation5 + $0x100] ss:$8 sps:$4 sm:$0xff]   ;;  %v2928_v49 = vld [vmem:[#allocation5 + $0x114] ss:$8 sps:$4 sm:$0xff]  }
  0xaf   :  { %v193_v24 = vpack.c.bf16 %v165_v23, %v165_v23  ;;  %v195_v48 = vpack.c.bf16 %v166_v44, %v166_v44  ;;  %v2926_v50 = vld [vmem:[#allocation5 + $0x110] ss:$8 sps:$4 sm:$0xff]   ;;  %v2931_v51 = vld [vmem:[#allocation5 + $0x124] ss:$8 sps:$4 sm:$0xff]   ;;  %v2929_v52 = vld [vmem:[#allocation5 + $0x120] ss:$8 sps:$4 sm:$0xff]  }
  0xb0   :  { %987 = vmatpush1.bf16.msra.mxu0 %v2885_v10  ;;  %v2934_v53 = vld [vmem:[#allocation5 + $0x134] ss:$8 sps:$4 sm:$0xff]   ;;  %v2932_v54 = vld [vmem:[#allocation5 + $0x130] ss:$8 sps:$4 sm:$0xff]   ;;  %v2937_v55 = vld [vmem:[#allocation5 + $0x144] ss:$8 sps:$4 sm:$0xff]  }
  0xb1   :  { %988 = vmatprep.subr.bf16.mxu0 %v2886_v11  ;;  %1012 = vmatprep.mubr.bf16.mxu0 %v193_v24  ;;  %v2935_v56 = vld [vmem:[#allocation5 + $0x140] ss:$8 sps:$4 sm:$0xff]   ;;  %v2940_v57 = vld [vmem:[#allocation5 + $0x154] ss:$8 sps:$4 sm:$0xff]   ;;  %v2938_v58 = vld [vmem:[#allocation5 + $0x150] ss:$8 sps:$4 sm:$0xff]  }
  0xb2   :  { %v2943_v59 = vld [vmem:[#allocation5 + $0x164] ss:$8 sps:$4 sm:$0xff]   ;;  %v2941_v60 = vld [vmem:[#allocation5 + $0x160] ss:$8 sps:$4 sm:$0xff]   ;;  %v2946_v61 = vld [vmem:[#allocation5 + $0x174] ss:$8 sps:$4 sm:$0xff]  }
  0xb3   :  { %v2944_v62 = vld [vmem:[#allocation5 + $0x170] ss:$8 sps:$4 sm:$0xff]   ;;  %v2949_v63 = vld [vmem:[#allocation5 + $0x184] ss:$8 sps:$4 sm:$0xff]   ;;  %v2947_v0 = vld [vmem:[#allocation5 + $0x180] ss:$8 sps:$4 sm:$0xff]  }
  0xb4   :  { %989 = vmatpush1.bf16.msra.mxu0 %v2888_v14  ;;  %v2952_v1 = vld [vmem:[#allocation5 + $0x194] ss:$8 sps:$4 sm:$0xff]   ;;  %v2950_v2 = vld [vmem:[#allocation5 + $0x190] ss:$8 sps:$4 sm:$0xff]   ;;  %v2955_v3 = vld [vmem:[#allocation5 + $0x1a4] ss:$8 sps:$4 sm:$0xff]  }
  0xb5   :  { %990 = vmatprep.subr.bf16.mxu0 %v2889_v15  ;;  %v2953_v4 = vld [vmem:[#allocation5 + $0x1a0] ss:$8 sps:$4 sm:$0xff]   ;;  %v2958_v5 = vld [vmem:[#allocation5 + $0x1b4] ss:$8 sps:$4 sm:$0xff]   ;;  %v2956_v6 = vld [vmem:[#allocation5 + $0x1b0] ss:$8 sps:$4 sm:$0xff]  }
  0xb6   :  { %v2961_v7 = vld [vmem:[#allocation5 + $0x1c4] ss:$8 sps:$4 sm:$0xff]   ;;  %v2959_v8 = vld [vmem:[#allocation5 + $0x1c0] ss:$8 sps:$4 sm:$0xff]   ;;  %v2964_v9 = vld [vmem:[#allocation5 + $0x1d4] ss:$8 sps:$4 sm:$0xff]  }
  0xb7   :  { %v2962_v10 = vld [vmem:[#allocation5 + $0x1d0] ss:$8 sps:$4 sm:$0xff]   ;;  %v2967_v11 = vld [vmem:[#allocation5 + $0x1e4] ss:$8 sps:$4 sm:$0xff]   ;;  %v2965_v14 = vld [vmem:[#allocation5 + $0x1e0] ss:$8 sps:$4 sm:$0xff]  }
  0xb8   :  { %991 = vmatpush1.bf16.msra.mxu0 %v2891_v17  ;;  %v3561_v12 = vld [vmem:[#allocation2 + $0x8] sm:$0xff]  ;;  %v2973_v20 = vld [vmem:[#allocation5 + $0x204] ss:$8 sps:$4 sm:$0xff]   ;;  %s2520_s28 = sshll.u32 %s3378_s8, 4  ;;  %s2521_s28 = int_to_ptr.vmem [resolvable:$true] %s2520_s28 }
  0xb9   :  { %992 = vmatprep.subr.bf16.mxu0 %v2892_v18  ;;  %v3565_v15 = vrot.slane %v3561_v12, %v3553_v16  ;;  %v2970_v17 = vld [vmem:[#allocation5 + $0x1f4] ss:$8 sps:$4 sm:$0xff]   ;;  %v2968_v18 = vld [vmem:[#allocation5 + $0x1f0] ss:$8 sps:$4 sm:$0xff]   ;;  %v2997_v38 = vld [vmem:[#allocation5 + $0x284] ss:$8 sps:$4 sm:$0xff]   ;;  %p3331_p3 = scmp.lt.s32.totalorder %s2521_s28, %s2521_s28 }
  0xba   :  { %v2976_v24 = vld [vmem:[#allocation5 + $0x214] ss:$8 sps:$4 sm:$0xff]   ;;  %s3326_s3 = scalar_lea.vmem %s2521_s28, 128 }
  0xbb   :  { %v182_v19 = vcombine.high %v3565_v15, %v3565_v15  ;;  %v3006_v44 = vld [vmem:[#allocation5 + $0x2b4] ss:$8 sps:$4 sm:$0xff]   ;;  %p3327_p2 = scmp.ne.s32.totalorder %s2521_s28, %s3326_s3  ;;  %p3332_p4 = scmp.lt.s32.totalorder %s3326_s3, %s3326_s3 }
  0xbc   :  { %993 = vmatpush1.bf16.msra.mxu0 %v2894_v21  ;;  %v194_v21 = vpack.c.bf16 %v3557_v41, %v3557_v41  ;;  %v2998_v41 = vld [vmem:[#allocation5 + $0x290] ss:$8 sps:$4 sm:$0xff]  }
  0xbd   :  { %994 = vmatprep.subr.bf16.mxu0 %v2895_v22  ;;  %v2971_v22 = vld [vmem:[#allocation5 + $0x200] ss:$8 sps:$4 sm:$0xff]   ;;  %v197_v23 = vpack.c.bf16 %v182_v19, %v182_v19  ;;  %v3052_v19 = vld [vmem:[#allocation5 + $0x3b0] ss:$8 sps:$4 sm:$0xff]   ;;  %p3333_p5 = por %p3332_p4, %p3331_p3 }
  0xbf   :  { %p3334_p6 = pnand %p3333_p5, %p3327_p2 }
  0xc0   :  { %995 = vmatpush1.bf16.msra.mxu0 %v2897_v25  ;;  %v2974_v25 = vld [vmem:[#allocation5 + $0x210] ss:$8 sps:$4 sm:$0xff]  }
  0xc1   :  { %996 = vmatprep.subr.bf16.mxu0 %v2898_v26  ;;  %v2979_v26 = vld [vmem:[#allocation5 + $0x224] ss:$8 sps:$4 sm:$0xff]  }
  0xc4   :  { %997 = vmatpush1.bf16.msra.mxu0 %v2900_v27  ;;  %v2977_v27 = vld [vmem:[#allocation5 + $0x220] ss:$8 sps:$4 sm:$0xff]  }
  0xc5   :  { %998 = vmatprep.subr.bf16.mxu0 %v2901_v28  ;;  %v2982_v28 = vld [vmem:[#allocation5 + $0x234] ss:$8 sps:$4 sm:$0xff]  }
  0xc8   :  { %999 = vmatpush1.bf16.msra.mxu0 %v2903_v29  ;;  %v2980_v29 = vld [vmem:[#allocation5 + $0x230] ss:$8 sps:$4 sm:$0xff]  }
  0xc9   :  { %1000 = vmatprep.subr.bf16.mxu0 %v2904_v30  ;;  %v2985_v30 = vld [vmem:[#allocation5 + $0x244] ss:$8 sps:$4 sm:$0xff]  }
  0xcc   :  { %1001 = vmatpush1.bf16.msra.mxu0 %v2906_v31  ;;  %v2983_v31 = vld [vmem:[#allocation5 + $0x240] ss:$8 sps:$4 sm:$0xff]  }
  0xcd   :  { %1002 = vmatprep.subr.bf16.mxu0 %v2907_v32  ;;  %v2988_v32 = vld [vmem:[#allocation5 + $0x254] ss:$8 sps:$4 sm:$0xff]  }
  0xd0   :  { %1003 = vmatpush1.bf16.msra.mxu0 %v2909_v33  ;;  %v2986_v33 = vld [vmem:[#allocation5 + $0x250] ss:$8 sps:$4 sm:$0xff]  }
  0xd1   :  { %1004 = vmatprep.subr.bf16.mxu0 %v2910_v34  ;;  %v2991_v34 = vld [vmem:[#allocation5 + $0x264] ss:$8 sps:$4 sm:$0xff]  }
  0xd4   :  { %1005 = vmatpush1.bf16.msra.mxu0 %v2912_v35  ;;  %v2989_v35 = vld [vmem:[#allocation5 + $0x260] ss:$8 sps:$4 sm:$0xff]  }
  0xd5   :  { %1006 = vmatprep.subr.bf16.mxu0 %v2913_v36  ;;  %v2994_v36 = vld [vmem:[#allocation5 + $0x274] ss:$8 sps:$4 sm:$0xff]  }
  0xd8   :  { %1007 = vmatpush1.bf16.msra.mxu0 %v2915_v37  ;;  %v2992_v37 = vld [vmem:[#allocation5 + $0x270] ss:$8 sps:$4 sm:$0xff]  }
  0xd9   :  { %1008 = vmatprep.subr.bf16.mxu0 %v2916_v39  ;;  %v2995_v39 = vld [vmem:[#allocation5 + $0x280] ss:$8 sps:$4 sm:$0xff]  }
  0xdc   :  { %1009 = vmatpush1.bf16.msra.mxu0 %v2918_v40  ;;  %v3000_v40 = vld [vmem:[#allocation5 + $0x294] ss:$8 sps:$4 sm:$0xff]  }
  0xdd   :  { %1010 = vmatprep.subr.bf16.mxu0 %v2919_v42  ;;  %v3003_v42 = vld [vmem:[#allocation5 + $0x2a4] ss:$8 sps:$4 sm:$0xff]  }
  0xe0   :  { %1011 = vmatpush1.bf16.msra.mxu0 %v2921_v43  ;;  %v3001_v43 = vld [vmem:[#allocation5 + $0x2a0] ss:$8 sps:$4 sm:$0xff]  }
  0xe1   :  { %1021 = vmatprep.subr.bf16.mxu0 %v2925_v45  ;;  %v3004_v45 = vld [vmem:[#allocation5 + $0x2b0] ss:$8 sps:$4 sm:$0xff]  }
  0xe3   :  { %1013 = vmatmul.mubr.bf16.vlgmr.msra.gmra.mrb[0].mxu0 %v192_v46  ;;  %v3009_v46 = vld [vmem:[#allocation5 + $0x2c4] ss:$8 sps:$4 sm:$0xff]  }
  0xe4   :  { %1022 = vmatpush1.bf16.msra.mxu0 %v2923_v47  ;;  %1053 = vmatprep.mubr.bf16.mxu0 %v195_v48  ;;  %v3007_v47 = vld [vmem:[#allocation5 + $0x2c0] ss:$8 sps:$4 sm:$0xff]   ;;  %v3012_v48 = vld [vmem:[#allocation5 + $0x2d4] ss:$8 sps:$4 sm:$0xff]  }
  0xe5   :  { %1023 = vmatprep.subr.bf16.mxu0 %v2928_v49  ;;  %v3010_v49 = vld [vmem:[#allocation5 + $0x2d0] ss:$8 sps:$4 sm:$0xff]  }
  0xe8   :  { %1024 = vmatpush1.bf16.msra.mxu0 %v2926_v50  ;;  %v167_v50 = vcombine.high %v3561_v12, %v3561_v12  ;;  %v3048_v12 = vld [vmem:[#allocation5 + $0x394] ss:$8 sps:$4 sm:$0xff]  }
  0xe9   :  { %1025 = vmatprep.subr.bf16.mxu0 %v2931_v51  ;;  %v3015_v51 = vld [vmem:[#allocation5 + $0x2e4] ss:$8 sps:$4 sm:$0xff]  }
  0xec   :  { %1026 = vmatpush1.bf16.msra.mxu0 %v2929_v52  ;;  %v3013_v52 = vld [vmem:[#allocation5 + $0x2e0] ss:$8 sps:$4 sm:$0xff]  }
  0xed   :  { %1027 = vmatprep.subr.bf16.mxu0 %v2934_v53  ;;  %v3574_v53 = vrot.slane %v167_v50, %v3553_v16  ;;  %v3022_v16 = vld [vmem:[#allocation5 + $0x310] ss:$8 sps:$4 sm:$0xff]   ;;  %v328_v50 = vld [vmem:[#allocation7] sm:$0x3] }
  0xf0   :  { %1028 = vmatpush1.bf16.msra.mxu0 %v2932_v54  ;;  %v3018_v54 = vld [vmem:[#allocation5 + $0x2f4] ss:$8 sps:$4 sm:$0xff]  }
  0xf1   :  { %1029 = vmatprep.subr.bf16.mxu0 %v2937_v55  ;;  %v3016_v55 = vld [vmem:[#allocation5 + $0x2f0] ss:$8 sps:$4 sm:$0xff]  }
  0xf4   :  { %1030 = vmatpush1.bf16.msra.mxu0 %v2935_v56  ;;  %v183_v56 = vcombine.high %v3574_v53, %v3574_v53 }
  0xf5   :  { %1031 = vmatprep.subr.bf16.mxu0 %v2940_v57  ;;  %v3021_v57 = vld [vmem:[#allocation5 + $0x304] ss:$8 sps:$4 sm:$0xff]  }
  0xf8   :  { %1032 = vmatpush1.bf16.msra.mxu0 %v2938_v58  ;;  %v196_v58 = vpack.c.bf16 %v3565_v15, %v3565_v15  ;;  %v3051_v15 = vld [vmem:[#allocation5 + $0x3a4] ss:$8 sps:$4 sm:$0xff]  }
  0xf9   :  { %1033 = vmatprep.subr.bf16.mxu0 %v2943_v59  ;;  %v3019_v59 = vld [vmem:[#allocation5 + $0x300] ss:$8 sps:$4 sm:$0xff]  }
  0xfc   :  { %1034 = vmatpush1.bf16.msra.mxu0 %v2941_v60  ;;  %v199_v60 = vpack.c.bf16 %v183_v56, %v183_v56 }
  0xfd   :  { %1035 = vmatprep.subr.bf16.mxu0 %v2946_v61  ;;  %v3024_v61 = vld [vmem:[#allocation5 + $0x314] ss:$8 sps:$4 sm:$0xff]  }
 0x100   :  { %1036 = vmatpush1.bf16.msra.mxu0 %v2944_v62  ;;  %v3027_v62 = vld [vmem:[#allocation5 + $0x324] ss:$8 sps:$4 sm:$0xff]  }
 0x101   :  { %1037 = vmatprep.subr.bf16.mxu0 %v2949_v63  ;;  %v3025_v63 = vld [vmem:[#allocation5 + $0x320] ss:$8 sps:$4 sm:$0xff]  }
 0x104   :  { %1038 = vmatpush1.bf16.msra.mxu0 %v2947_v0  ;;  %v3030_v0 = vld [vmem:[#allocation5 + $0x334] ss:$8 sps:$4 sm:$0xff]  }
 0x105   :  { %1039 = vmatprep.subr.bf16.mxu0 %v2952_v1  ;;  %v3028_v1 = vld [vmem:[#allocation5 + $0x330] ss:$8 sps:$4 sm:$0xff]  }
 0x108   :  { %1040 = vmatpush1.bf16.msra.mxu0 %v2950_v2  ;;  %v3033_v2 = vld [vmem:[#allocation5 + $0x344] ss:$8 sps:$4 sm:$0xff]  }
 0x109   :  { %1041 = vmatprep.subr.bf16.mxu0 %v2955_v3  ;;  %v3031_v3 = vld [vmem:[#allocation5 + $0x340] ss:$8 sps:$4 sm:$0xff]  }
 0x10c   :  { %1042 = vmatpush1.bf16.msra.mxu0 %v2953_v4  ;;  %v3036_v4 = vld [vmem:[#allocation5 + $0x354] ss:$8 sps:$4 sm:$0xff]  }
 0x10d   :  { %1043 = vmatprep.subr.bf16.mxu0 %v2958_v5  ;;  %v3034_v5 = vld [vmem:[#allocation5 + $0x350] ss:$8 sps:$4 sm:$0xff]  }
 0x110   :  { %1044 = vmatpush1.bf16.msra.mxu0 %v2956_v6  ;;  %v3039_v6 = vld [vmem:[#allocation5 + $0x364] ss:$8 sps:$4 sm:$0xff]  }
 0x111   :  { %1045 = vmatprep.subr.bf16.mxu0 %v2961_v7  ;;  %v3037_v7 = vld [vmem:[#allocation5 + $0x360] ss:$8 sps:$4 sm:$0xff]  }
 0x114   :  { %1046 = vmatpush1.bf16.msra.mxu0 %v2959_v8  ;;  %v3042_v8 = vld [vmem:[#allocation5 + $0x374] ss:$8 sps:$4 sm:$0xff]  }
 0x115   :  { %1047 = vmatprep.subr.bf16.mxu0 %v2964_v9  ;;  %v3040_v9 = vld [vmem:[#allocation5 + $0x370] ss:$8 sps:$4 sm:$0xff]  }
 0x118   :  { %1048 = vmatpush1.bf16.msra.mxu0 %v2962_v10  ;;  %v3045_v10 = vld [vmem:[#allocation5 + $0x384] ss:$8 sps:$4 sm:$0xff]  }
 0x119   :  { %1049 = vmatprep.subr.bf16.mxu0 %v2967_v11  ;;  %v3043_v11 = vld [vmem:[#allocation5 + $0x380] ss:$8 sps:$4 sm:$0xff]  }
 0x11c   :  { %1050 = vmatpush1.bf16.msra.mxu0 %v2965_v14  ;;  %v3046_v14 = vld [vmem:[#allocation5 + $0x390] ss:$8 sps:$4 sm:$0xff]  }
 0x11d   :  { %1051 = vmatprep.subr.bf16.mxu0 %v2970_v17  ;;  %v3049_v17 = vld [vmem:[#allocation5 + $0x3a0] ss:$8 sps:$4 sm:$0xff]  }
 0x120   :  { %1052 = vmatpush1.bf16.msra.mxu0 %v2968_v18  ;;  %v3054_v18 = vld [vmem:[#allocation5 + $0x3b4] ss:$8 sps:$4 sm:$0xff]  }
 0x121   :  { %1062 = vmatprep.subr.bf16.mxu0 %v2973_v20  ;;  %v3057_v20 = vld [vmem:[#allocation5 + $0x3c4] ss:$8 sps:$4 sm:$0xff]  }
 0x123   :  { %1054 = vmatmul.mubr.bf16.vlgmr.msra.gmra.mrb[0].mxu0 %v194_v21  ;;  %v3055_v21 = vld [vmem:[#allocation5 + $0x3c0] ss:$8 sps:$4 sm:$0xff]  }
 0x124   :  { %1063 = vmatpush1.bf16.msra.mxu0 %v2971_v22  ;;  %1094 = vmatprep.mubr.bf16.mxu0 %v197_v23  ;;  %v3060_v22 = vld [vmem:[#allocation5 + $0x3d4] ss:$8 sps:$4 sm:$0xff]   ;;  %v3058_v23 = vld [vmem:[#allocation5 + $0x3d0] ss:$8 sps:$4 sm:$0xff]  }
 0x125   :  { %1064 = vmatprep.subr.bf16.mxu0 %v2976_v24  ;;  %v3063_v24 = vld [vmem:[#allocation5 + $0x3e4] ss:$8 sps:$4 sm:$0xff]  }
 0x128   :  { %1065 = vmatpush1.bf16.msra.mxu0 %v2974_v25  ;;  %v3061_v25 = vld [vmem:[#allocation5 + $0x3e0] ss:$8 sps:$4 sm:$0xff]  }
 0x129   :  { %1066 = vmatprep.subr.bf16.mxu0 %v2979_v26  ;;  %v3066_v26 = vld [vmem:[#allocation5 + $0x3f4] ss:$8 sps:$4 sm:$0xff]  }
 0x12c   :  { %1067 = vmatpush1.bf16.msra.mxu0 %v2977_v27  ;;  %v3064_v27 = vld [vmem:[#allocation5 + $0x3f0] ss:$8 sps:$4 sm:$0xff]  }
 0x12d   :  { %1068 = vmatprep.subr.bf16.mxu0 %v2982_v28  ;;  %v3068_v28 = vld [vmem:[#allocation8 + $0x40] sm:$0xff]  }
 0x130   :  { %1069 = vmatpush1.bf16.msra.mxu0 %v2980_v29  ;;  %v198_v29 = vpack.c.bf16 %v3574_v53, %v3574_v53 }
 0x131   :  { %1070 = vmatprep.subr.bf16.mxu0 %v2985_v30  ;;  %v3069_v30 = vld [vmem:[#allocation8] sm:$0xff]  }
 0x134   :  { %1071 = vmatpush1.bf16.msra.mxu0 %v2983_v31  ;;  %v3070_v31 = vld [vmem:[#allocation8 + $0x48] sm:$0xff]  }
 0x135   :  { %1072 = vmatprep.subr.bf16.mxu0 %v2988_v32  ;;  %v3071_v32 = vld [vmem:[#allocation8 + $0x8] sm:$0xff]  }
 0x138   :  { %1073 = vmatpush1.bf16.msra.mxu0 %v2986_v33  ;;  %v3072_v33 = vld [vmem:[#allocation8 + $0x50] sm:$0xff]  }
 0x139   :  { %1074 = vmatprep.subr.bf16.mxu0 %v2991_v34  ;;  %v3073_v34 = vld [vmem:[#allocation8 + $0x10] sm:$0xff]  }
 0x13c   :  { %1075 = vmatpush1.bf16.msra.mxu0 %v2989_v35  ;;  %v3074_v35 = vld [vmem:[#allocation8 + $0x58] sm:$0xff]  }
 0x13d   :  { %1076 = vmatprep.subr.bf16.mxu0 %v2994_v36  ;;  %v3075_v36 = vld [vmem:[#allocation8 + $0x18] sm:$0xff]  }
 0x140   :  { %1077 = vmatpush1.bf16.msra.mxu0 %v2992_v37  ;;  %v3076_v37 = vld [vmem:[#allocation8 + $0x60] sm:$0xff]  }
 0x141   :  { %1078 = vmatprep.subr.bf16.mxu0 %v2997_v38  ;;  %v3077_v38 = vld [vmem:[#allocation8 + $0x20] sm:$0xff]  }
 0x144   :  { %1079 = vmatpush1.bf16.msra.mxu0 %v2995_v39  ;;  %v3078_v39 = vld [vmem:[#allocation8 + $0x68] sm:$0xff]  }
 0x145   :  { %1080 = vmatprep.subr.bf16.mxu0 %v3000_v40  ;;  %v3079_v40 = vld [vmem:[#allocation8 + $0x28] sm:$0xff]  }
 0x148   :  { %1081 = vmatpush1.bf16.msra.mxu0 %v2998_v41  ;;  %v3080_v41 = vld [vmem:[#allocation8 + $0x70] sm:$0xff]  }
 0x149   :  { %1082 = vmatprep.subr.bf16.mxu0 %v3003_v42  ;;  %v3081_v42 = vld [vmem:[#allocation8 + $0x30] sm:$0xff]  }
 0x14c   :  { %1083 = vmatpush1.bf16.msra.mxu0 %v3001_v43  ;;  %v3082_v43 = vld [vmem:[#allocation8 + $0x78] sm:$0xff]  }
 0x14d   :  { %1084 = vmatprep.subr.bf16.mxu0 %v3006_v44  ;;  %v3083_v44 = vld [vmem:[#allocation8 + $0x38] sm:$0xff]  }
 0x150   :  { %1085 = vmatpush1.bf16.msra.mxu0 %v3004_v45  ;;  %v3084_v45 = vld [vmem:[#allocation11 + $0x4] ss:$8 sps:$4 sm:$0xff]  }
 0x151   :  { %1086 = vmatprep.subr.bf16.mxu0 %v3009_v46  ;;  %v3086_v46 = vld [vmem:[#allocation11] ss:$8 sps:$4 sm:$0xff]   ;;  %1388 = vmatprep.subr.bf16.mxu1 %v3084_v45 }
 0x152   :  { %1389 = vmatpush1.bf16.msra.mxu1 %v3086_v46  ;;  %v1497_v45 = vld [vmem:[#allocation14 + $0x200] sm:$0xff] }
 0x153   :  { %v1501_v46 = vld [vmem:[#allocation14 + $0x220] sm:$0xff] }
 0x154   :  { %1087 = vmatpush1.bf16.msra.mxu0 %v3007_v47  ;;  %v3087_v47 = vld [vmem:[#allocation11 + $0x14] ss:$8 sps:$4 sm:$0xff]  }
 0x155   :  { %1088 = vmatprep.subr.bf16.mxu0 %v3012_v48  ;;  %v3089_v48 = vld [vmem:[#allocation11 + $0x10] ss:$8 sps:$4 sm:$0xff]   ;;  %1390 = vmatprep.subr.bf16.mxu1 %v3087_v47 }
 0x156   :  { %1391 = vmatpush1.bf16.msra.mxu1 %v3089_v48  ;;  %v2752_v48 = vcombine.high %v1497_v45, %v1501_v46 }
 0x158   :  { %1089 = vmatpush1.bf16.msra.mxu0 %v3010_v49  ;;  %v3583_v49 = vsub.s32 0, %v3550_v13 }
 0x159   :  { %1090 = vmatprep.subr.bf16.mxu0 %v3015_v51  ;;  %v3586_v51 = vsub.s32 1, %v3550_v13 }
 0x15b   :  { %v337_v53 = vrot.slane %v328_v50, %v3586_v51 }
 0x15c   :  { %1091 = vmatpush1.bf16.msra.mxu0 %v3013_v52  ;;  %v333_v52 = vrot.slane %v328_v50, %v3583_v49  ;;  %v1505_v50 = vld [vmem:[#allocation14 + $0x240] sm:$0xff] }
 0x15d   :  { %1092 = vmatprep.subr.bf16.mxu0 %v3018_v54 }
 0x160   :  { %1093 = vmatpush1.bf16.msra.mxu0 %v3016_v55 }
 0x161   :  { %1103 = vmatprep.subr.bf16.mxu0 %v3021_v57 }
 0x163   :  { %1095 = vmatmul.mubr.bf16.vlgmr.msra.gmra.mrb[0].mxu0 %v196_v58 }
 0x164   :  { %1104 = vmatpush1.bf16.msra.mxu0 %v3019_v59  ;;  %1135 = vmatprep.mubr.bf16.mxu0 %v199_v60 }
 0x165   :  { %1105 = vmatprep.subr.bf16.mxu0 %v3024_v61 }
 0x168   :  { %1106 = vmatpush1.bf16.msra.mxu0 %v3022_v16 }
 0x169   :  { %1107 = vmatprep.subr.bf16.mxu0 %v3027_v62 }
 0x16c   :  { %1108 = vmatpush1.bf16.msra.mxu0 %v3025_v63  ;;  %v3090_v63 = vld [vmem:[#allocation11 + $0x24] ss:$8 sps:$4 sm:$0xff]  }
 0x16d   :  { %1109 = vmatprep.subr.bf16.mxu0 %v3030_v0  ;;  %v3092_v0 = vld [vmem:[#allocation11 + $0x20] ss:$8 sps:$4 sm:$0xff]   ;;  %1392 = vmatprep.subr.bf16.mxu1 %v3090_v63 }
 0x16e   :  { %1393 = vmatpush1.bf16.msra.mxu1 %v3092_v0  ;;  %v1533_v63 = vld [vmem:[#allocation14 + $0x320] sm:$0xff] }
 0x170   :  { %1110 = vmatpush1.bf16.msra.mxu0 %v3028_v1  ;;  %v3093_v1 = vld [vmem:[#allocation11 + $0x34] ss:$8 sps:$4 sm:$0xff]  }
 0x171   :  { %1111 = vmatprep.subr.bf16.mxu0 %v3033_v2  ;;  %v3095_v2 = vld [vmem:[#allocation11 + $0x30] ss:$8 sps:$4 sm:$0xff]   ;;  %1394 = vmatprep.subr.bf16.mxu1 %v3093_v1 }
 0x172   :  { %1395 = vmatpush1.bf16.msra.mxu1 %v3095_v2  ;;  %v1537_v2 = vld [vmem:[#allocation14 + $0x340] sm:$0xff] }
 0x174   :  { %1112 = vmatpush1.bf16.msra.mxu0 %v3031_v3  ;;  %v3376_v3 = vmov 0  }
 0x175   :  { %1113 = vmatprep.subr.bf16.mxu0 %v3036_v4  ;;  %1420 = vmatprep.mubr.bf16.mxu1 %v3376_v3  ;;  %v1433_v4 = vld [vmem:[#allocation14] sm:$0xff] }
 0x176   :  { %v1541_v3 = vld [vmem:[#allocation14 + $0x360] sm:$0xff] }
 0x178   :  { %1114 = vmatpush1.bf16.msra.mxu0 %v3034_v5  ;;  %v1437_v5 = vld [vmem:[#allocation14 + $0x20] sm:$0xff] }
 0x179   :  { %1115 = vmatprep.subr.bf16.mxu0 %v3039_v6  ;;  %v2687_v6 = vcombine.low %v1433_v4, %v1437_v5 }
 0x17c   :  { %1116 = vmatpush1.bf16.msra.mxu0 %v3037_v7  ;;  %v2688_v7 = vcombine.high %v1433_v4, %v1437_v5  ;;  %v2792_v5 = vcombine.high %v1537_v2, %v1541_v3 }
 0x17d   :  { %1117 = vmatprep.subr.bf16.mxu0 %v3042_v8 }
 0x17e   :  { %2243 = vmatprep.subr.bf16.mxu1 %v2688_v7  ;;  %v1545_v7 = vld [vmem:[#allocation14 + $0x380] sm:$0xff] }
 0x180   :  { %1118 = vmatpush1.bf16.msra.mxu0 %v3040_v9  ;;  %v2661_v9 = vld [vmem:[#allocation10] ss:$0 sm:$0xff] }
 0x181   :  { %1119 = vmatprep.subr.bf16.mxu0 %v3045_v10 }
 0x184   :  { %1120 = vmatpush1.bf16.msra.mxu0 %v3043_v11 }
 0x185   :  { %1121 = vmatprep.subr.bf16.mxu0 %v3048_v12 }
 0x188   :  { %1122 = vmatpush1.bf16.msra.mxu0 %v3046_v14 }
 0x189   :  { %1123 = vmatprep.subr.bf16.mxu0 %v3051_v15  ;;  %v1441_v15 = vld [vmem:[#allocation14 + $0x40] sm:$0xff] }
 0x18c   :  { %1124 = vmatpush1.bf16.msra.mxu0 %v3049_v17  ;;  %v1445_v17 = vld [vmem:[#allocation14 + $0x60] sm:$0xff] }
 0x18d   :  { %1125 = vmatprep.subr.bf16.mxu0 %v3054_v18 }
 0x190   :  { %1126 = vmatpush1.bf16.msra.mxu0 %v3052_v19 }
 0x191   :  { %1127 = vmatprep.subr.bf16.mxu0 %v3057_v20  ;;  %v2696_v20 = vcombine.high %v1441_v15, %v1445_v17 }
 0x194   :  { %1128 = vmatpush1.bf16.msra.mxu0 %v3055_v21  ;;  %v1449_v21 = vld [vmem:[#allocation14 + $0x80] sm:$0xff] }
 0x195   :  { %1129 = vmatprep.subr.bf16.mxu0 %v3060_v22  ;;  %v1453_v22 = vld [vmem:[#allocation14 + $0xa0] sm:$0xff] }
 0x198   :  { %1130 = vmatpush1.bf16.msra.mxu0 %v3058_v23  ;;  %v2695_v23 = vcombine.low %v1441_v15, %v1445_v17  ;;  %v1434_v17 = vld [vmem:[#allocation14 + $0x8] sm:$0xff] }
 0x199   :  { %1131 = vmatprep.subr.bf16.mxu0 %v3063_v24  ;;  %v2704_v24 = vcombine.high %v1449_v21, %v1453_v22 }
 0x19c   :  { %1132 = vmatpush1.bf16.msra.mxu0 %v3061_v25  ;;  %v1457_v25 = vld [vmem:[#allocation14 + $0xc0] sm:$0xff] }
 0x19d   :  { %1133 = vmatprep.subr.bf16.mxu0 %v3066_v26  ;;  %v1461_v26 = vld [vmem:[#allocation14 + $0xe0] sm:$0xff] }
 0x1a0   :  { %1134 = vmatpush1.bf16.msra.mxu0 %v3064_v27  ;;  %v2703_v27 = vcombine.low %v1449_v21, %v1453_v22  ;;  %v1332_v21 = vld [vmem:[#allocation13] sm:$0x3] }
 0x1a1   :  { %2819 = vmatprep.subr.bf16.mxu0 %v3068_v28  ;;  %v2712_v28 = vcombine.high %v1457_v25, %v1461_v26  ;;  %v1337_v22 = vrot.slane %v1332_v21, %v3583_v49 }
 0x1a3   :  { %1136 = vmatmul.mubr.bf16.vlgmr.msra.gmra.mrb[0].mxu0 %v198_v29  ;;  %v1465_v29 = vld [vmem:[#allocation14 + $0x100] sm:$0xff] }
 0x1a4   :  { %2820 = vmatpush3.bf16.msra.mxu0 %v3069_v30  ;;  %v1469_v30 = vld [vmem:[#allocation14 + $0x120] sm:$0xff] }
 0x1a5   :  { %2821 = vmatprep.subr.bf16.mxu0 %v3070_v31  ;;  %v2711_v31 = vcombine.low %v1457_v25, %v1461_v26 }
 0x1a8   :  { %2822 = vmatpush3.bf16.msra.mxu0 %v3071_v32  ;;  %v2720_v32 = vcombine.high %v1465_v29, %v1469_v30 }
 0x1a9   :  { %2823 = vmatprep.subr.bf16.mxu0 %v3072_v33  ;;  %v1473_v33 = vld [vmem:[#allocation14 + $0x140] sm:$0xff] }
 0x1ac   :  { %2824 = vmatpush3.bf16.msra.mxu0 %v3073_v34  ;;  %v1477_v34 = vld [vmem:[#allocation14 + $0x160] sm:$0xff] }
 0x1ad   :  { %2825 = vmatprep.subr.bf16.mxu0 %v3074_v35  ;;  %v2719_v35 = vcombine.low %v1465_v29, %v1469_v30 }
 0x1b0   :  { %2826 = vmatpush3.bf16.msra.mxu0 %v3075_v36  ;;  %v2728_v36 = vcombine.high %v1473_v33, %v1477_v34 }
 0x1b1   :  { %2827 = vmatprep.subr.bf16.mxu0 %v3076_v37  ;;  %v1481_v37 = vld [vmem:[#allocation14 + $0x180] sm:$0xff] }
 0x1b4   :  { %2828 = vmatpush3.bf16.msra.mxu0 %v3077_v38  ;;  %v1485_v38 = vld [vmem:[#allocation14 + $0x1a0] sm:$0xff] }
 0x1b5   :  { %2829 = vmatprep.subr.bf16.mxu0 %v3078_v39  ;;  %v2727_v39 = vcombine.low %v1473_v33, %v1477_v34  ;;  %v1446_v33 = vld [vmem:[#allocation14 + $0x68] sm:$0xff] }
 0x1b8   :  { %2830 = vmatpush3.bf16.msra.mxu0 %v3079_v40  ;;  %v2736_v40 = vcombine.high %v1481_v37, %v1485_v38 }
 0x1b9   :  { %2831 = vmatprep.subr.bf16.mxu0 %v3080_v41  ;;  %v1489_v41 = vld [vmem:[#allocation14 + $0x1c0] sm:$0xff] }
 0x1bc   :  { %2832 = vmatpush3.bf16.msra.mxu0 %v3081_v42  ;;  %v1493_v42 = vld [vmem:[#allocation14 + $0x1e0] sm:$0xff] }
 0x1bd   :  { %2833 = vmatprep.subr.bf16.mxu0 %v3082_v43  ;;  %v2735_v43 = vcombine.low %v1481_v37, %v1485_v38  ;;  %v2743_v47 = vcombine.low %v1489_v41, %v1493_v42  ;;  %v1450_v37 = vld [vmem:[#allocation14 + $0x88] sm:$0xff] }
 0x1be   :  { %v1454_v38 = vld [vmem:[#allocation14 + $0xa8] sm:$0xff] }
 0x1c0   :  { %2834 = vmatpush3.bf16.msra.mxu0 %v3083_v44  ;;  %v2744_v44 = vcombine.high %v1489_v41, %v1493_v42  ;;  %v1458_v41 = vld [vmem:[#allocation14 + $0xc8] sm:$0xff] }
 0x1c1   :  { %v1462_v42 = vld [vmem:[#allocation14 + $0xe8] sm:$0xff] }
 0x276   :  { %v1137_v54 = vpop.f32.mrb[0].mxu0 }
 0x277   :  { %v2841_v55 = vadd.f32 %v1137_v54, %v333_v52  ;;  %v1139_v56 = vpop.f32.mrb[1].mxu0  ;;  %v1509_v52 = vld [vmem:[#allocation14 + $0x260] sm:$0xff] }
 0x278   :  { %v2842_v57 = vadd.f32 %v1139_v56, %v337_v53  ;;  %v1141_v58 = vpop.f32.mrb[2].mxu0  ;;  %v2751_v53 = vcombine.low %v1497_v45, %v1501_v46  ;;  %v2760_v54 = vcombine.high %v1505_v50, %v1509_v52  ;;  %v1517_v56 = vld [vmem:[#allocation14 + $0x2a0] sm:$0xff]  ;;  %v1466_v45 = vld [vmem:[#allocation14 + $0x108] sm:$0xff] }
 0x279   :  { %v1144_v59 = vmax.f32 %v2841_v55, 0.0  ;;  %v1142_v60 = vpop.f32.mrb[3].mxu0  ;;  %v1513_v55 = vld [vmem:[#allocation14 + $0x280] sm:$0xff]  ;;  %v1470_v46 = vld [vmem:[#allocation14 + $0x128] sm:$0xff] }
 0x27a   :  { %v1145_v61 = vmax.f32 %v2842_v57, 0.0  ;;  %v2759_v57 = vcombine.low %v1505_v50, %v1509_v52  ;;  %v2768_v58 = vcombine.high %v1513_v55, %v1517_v56  ;;  %v1525_v60 = vld [vmem:[#allocation14 + $0x2e0] sm:$0xff]  ;;  %v1474_v50 = vld [vmem:[#allocation14 + $0x148] sm:$0xff] }
 0x27b   :  { %v1146_v62 = vpack.c.bf16 %v1144_v59, %v1144_v59  ;;  %v1521_v59 = vld [vmem:[#allocation14 + $0x2c0] sm:$0xff]  ;;  %v1478_v52 = vld [vmem:[#allocation14 + $0x168] sm:$0xff] }
 0x27c   :  { %v1147_v16 = vpack.c.bf16 %v1145_v61, %v1145_v61  ;;  %v2767_v61 = vcombine.low %v1513_v55, %v1517_v56  ;;  %v2775_v0 = vcombine.low %v1521_v59, %v1525_v60  ;;  %v1482_v55 = vld [vmem:[#allocation14 + $0x188] sm:$0xff] }
 0x27d   :  { %v1486_v56 = vld [vmem:[#allocation14 + $0x1a8] sm:$0xff] }
 0x27e   :  { %1315 = vmatprep.mubr.bf16.mxu0 %v1147_v16  ;;  %v2776_v16 = vcombine.high %v1521_v59, %v1525_v60  ;;  %v1490_v59 = vld [vmem:[#allocation14 + $0x1c8] sm:$0xff] }
 0x27f   :  { %1316 = vmatmul.mubr.bf16.vlgmr.msra.gmra.mrb[4].mxu0 %v1146_v62  ;;  %v1529_v62 = vld [vmem:[#allocation14 + $0x300] sm:$0xff]  ;;  %v1494_v60 = vld [vmem:[#allocation14 + $0x1e8] sm:$0xff] }
 0x280   :  { %v2784_v1 = vcombine.high %v1529_v62, %v1533_v63  ;;  %v2783_v4 = vcombine.low %v1529_v62, %v1533_v63  ;;  %v1498_v62 = vld [vmem:[#allocation14 + $0x208] sm:$0xff] }
 0x281   :  { %v1502_v63 = vld [vmem:[#allocation14 + $0x228] sm:$0xff] }
 0x352   :  { %v2835_v8 = vpop.f32.mrb[4].mxu0 }
 0x353   :  { %v2836_v10 = vpop.f32.mrb[5].mxu0 }
 0x354   :  { %v2837_v11 = vadd.f32 %v2836_v10, %v2835_v8  ;;  %v2838_v12 = vpop.f32.mrb[6].mxu0  ;;  %v1549_v8 = vld [vmem:[#allocation14 + $0x3a0] sm:$0xff] }
 0x355   :  { %v2839_v14 = vpop.f32.mrb[7].mxu0  ;;  %v2799_v10 = vcombine.low %v1545_v7, %v1549_v8  ;;  %v1557_v12 = vld [vmem:[#allocation14 + $0x3e0] sm:$0xff] }
 0x356   :  { %v1318_v18 = vadd.f32 %v2837_v11, %v2661_v9  ;;  %v2800_v9 = vcombine.high %v1545_v7, %v1549_v8  ;;  %v1553_v11 = vld [vmem:[#allocation14 + $0x3c0] sm:$0xff]  ;;  %v1518_v7 = vld [vmem:[#allocation14 + $0x2a8] sm:$0xff] }
 0x357   :  { %v2808_v14 = vcombine.high %v1553_v11, %v1557_v12  ;;  %v2807_v15 = vcombine.low %v1553_v11, %v1557_v12  ;;  %v1526_v11 = vld [vmem:[#allocation14 + $0x2e8] sm:$0xff] }
 0x358   :  { %v1323_v19 = vpack.c.bf16 %v1318_v18, %v1318_v18  ;;  %v1438_v18 = vld [vmem:[#allocation14 + $0x28] sm:$0xff] }
 0x35a   :  { %2686 = vmatmul.mubr.msk.bf16.vlgmr.msra.gmra.mrb[0].mxu1 %vm1384_vm0, %v1323_v19  ;;  %v2690_v19 = vcombine.high %v1434_v17, %v1438_v18 }
 0x35b   :  { %2244 = vmatpush1.bf16.msra.mxu1 %v2687_v6  ;;  %v2791_v6 = vcombine.low %v1537_v2, %v1541_v3  ;;  %v1506_v2 = vld [vmem:[#allocation14 + $0x248] sm:$0xff] }
 0x35c   :  { %2245 = vmatprep.subr.bf16.mxu1 %v2696_v20  ;;  %v2689_v20 = vcombine.low %v1434_v17, %v1438_v18  ;;  %v1510_v3 = vld [vmem:[#allocation14 + $0x268] sm:$0xff] }
 0x35d   :  { %v2761_v8 = vcombine.low %v1506_v2, %v1510_v3  ;;  %v1534_v17 = vld [vmem:[#allocation14 + $0x328] sm:$0xff] }
 0x35f   :  { %2246 = vmatpush1.bf16.msra.mxu1 %v2695_v23  ;;  %v1341_v23 = vrot.slane %v1332_v21, %v3586_v51  ;;  %v1542_v21 = vld [vmem:[#allocation14 + $0x368] sm:$0xff] }
 0x360   :  { %2247 = vmatprep.subr.bf16.mxu1 %v2704_v24 }
 0x363   :  { %2248 = vmatpush1.bf16.msra.mxu1 %v2703_v27 }
 0x364   :  { %2249 = vmatprep.subr.bf16.mxu1 %v2712_v28 }
 0x367   :  { %2250 = vmatpush1.bf16.msra.mxu1 %v2711_v31 }
 0x368   :  { %2251 = vmatprep.subr.bf16.mxu1 %v2720_v32  ;;  %v1442_v32 = vld [vmem:[#allocation14 + $0x48] sm:$0xff] }
 0x36b   :  { %2252 = vmatpush1.bf16.msra.mxu1 %v2719_v35 }
 0x36c   :  { %2253 = vmatprep.subr.bf16.mxu1 %v2728_v36  ;;  %v2698_v36 = vcombine.high %v1442_v32, %v1446_v33 }
 0x36f   :  { %2254 = vmatpush1.bf16.msra.mxu1 %v2727_v39  ;;  %v2697_v39 = vcombine.low %v1442_v32, %v1446_v33  ;;  %v1435_v32 = vld [vmem:[#allocation14 + $0x10] sm:$0xff] }
 0x370   :  { %2255 = vmatprep.subr.bf16.mxu1 %v2736_v40  ;;  %v2706_v40 = vcombine.high %v1450_v37, %v1454_v38  ;;  %v1439_v33 = vld [vmem:[#allocation14 + $0x30] sm:$0xff] }
 0x373   :  { %2256 = vmatpush1.bf16.msra.mxu1 %v2735_v43  ;;  %v2705_v43 = vcombine.low %v1450_v37, %v1454_v38  ;;  %v2692_v37 = vcombine.high %v1435_v32, %v1439_v33  ;;  %v1443_v38 = vld [vmem:[#allocation14 + $0x50] sm:$0xff] }
 0x374   :  { %2257 = vmatprep.subr.bf16.mxu1 %v2744_v44  ;;  %v2714_v44 = vcombine.high %v1458_v41, %v1462_v42 }
 0x377   :  { %2258 = vmatpush1.bf16.msra.mxu1 %v2743_v47  ;;  %v2713_v47 = vcombine.low %v1458_v41, %v1462_v42  ;;  %v1451_v42 = vld [vmem:[#allocation14 + $0x90] sm:$0xff] }
 0x378   :  { %2259 = vmatprep.subr.bf16.mxu1 %v2752_v48  ;;  %v2722_v48 = vcombine.high %v1466_v45, %v1470_v46 }
 0x37b   :  { %2260 = vmatpush1.bf16.msra.mxu1 %v2751_v53  ;;  %v2721_v53 = vcombine.low %v1466_v45, %v1470_v46  ;;  %v1459_v46 = vld [vmem:[#allocation14 + $0xd0] sm:$0xff] }
 0x37c   :  { %2261 = vmatprep.subr.bf16.mxu1 %v2760_v54  ;;  %v2730_v54 = vcombine.high %v1474_v50, %v1478_v52 }
 0x37f   :  { %2262 = vmatpush1.bf16.msra.mxu1 %v2759_v57  ;;  %v2729_v57 = vcombine.low %v1474_v50, %v1478_v52  ;;  %v1467_v52 = vld [vmem:[#allocation14 + $0x110] sm:$0xff] }
 0x380   :  { %2263 = vmatprep.subr.bf16.mxu1 %v2768_v58  ;;  %v2738_v58 = vcombine.high %v1482_v55, %v1486_v56 }
 0x383   :  { %2264 = vmatpush1.bf16.msra.mxu1 %v2767_v61  ;;  %v2737_v61 = vcombine.low %v1482_v55, %v1486_v56  ;;  %v1475_v56 = vld [vmem:[#allocation14 + $0x150] sm:$0xff] }
 0x384   :  { %2265 = vmatprep.subr.bf16.mxu1 %v2776_v16  ;;  %v2746_v16 = vcombine.high %v1490_v59, %v1494_v60 }
 0x387   :  { %2266 = vmatpush1.bf16.msra.mxu1 %v2775_v0  ;;  %v2745_v0 = vcombine.low %v1490_v59, %v1494_v60  ;;  %v1483_v60 = vld [vmem:[#allocation14 + $0x190] sm:$0xff] }
 0x388   :  { %2267 = vmatprep.subr.bf16.mxu1 %v2784_v1  ;;  %v2754_v1 = vcombine.high %v1498_v62, %v1502_v63 }
 0x38b   :  { %2268 = vmatpush1.bf16.msra.mxu1 %v2783_v4  ;;  %v2753_v4 = vcombine.low %v1498_v62, %v1502_v63  ;;  %v1491_v63 = vld [vmem:[#allocation14 + $0x1d0] sm:$0xff] }
 0x38c   :  { %2269 = vmatprep.subr.bf16.mxu1 %v2792_v5  ;;  %v2762_v5 = vcombine.high %v1506_v2, %v1510_v3  ;;  %v1499_v3 = vld [vmem:[#allocation14 + $0x210] sm:$0xff] }
 0x38f   :  { %2270 = vmatpush1.bf16.msra.mxu1 %v2791_v6  ;;  %v1514_v6 = vld [vmem:[#allocation14 + $0x288] sm:$0xff] }
 0x390   :  { %2271 = vmatprep.subr.bf16.mxu1 %v2800_v9  ;;  %v2770_v9 = vcombine.high %v1514_v6, %v1518_v7  ;;  %v2769_v12 = vcombine.low %v1514_v6, %v1518_v7  ;;  %v1507_v7 = vld [vmem:[#allocation14 + $0x250] sm:$0xff] }
 0x393   :  { %2272 = vmatpush1.bf16.msra.mxu1 %v2799_v10  ;;  %v1522_v10 = vld [vmem:[#allocation14 + $0x2c8] sm:$0xff] }
 0x394   :  { %2273 = vmatprep.subr.bf16.mxu1 %v2808_v14  ;;  %v2778_v14 = vcombine.high %v1522_v10, %v1526_v11  ;;  %v2777_v18 = vcombine.low %v1522_v10, %v1526_v11  ;;  %v1515_v11 = vld [vmem:[#allocation14 + $0x290] sm:$0xff] }
 0x397   :  { %2274 = vmatpush1.bf16.msra.mxu1 %v2807_v15  ;;  %v1530_v15 = vld [vmem:[#allocation14 + $0x308] sm:$0xff] }
 0x398   :  { %2284 = vmatprep.subr.bf16.mxu1 %v2690_v19  ;;  %v2786_v19 = vcombine.high %v1530_v15, %v1534_v17 }
 0x42d   :  { %v1422_v24 = vpop.f32.mrb[0].mxu1 }
 0x42e   :  { %v1423_v25 = vadd.f32 %v1422_v24, %v1337_v22  ;;  %v1424_v26 = vpop.f32.mrb[1].mxu1  ;;  %v2785_v22 = vcombine.low %v1530_v15, %v1534_v17  ;;  %v1546_v24 = vld [vmem:[#allocation14 + $0x388] sm:$0xff]  ;;  %v1523_v17 = vld [vmem:[#allocation14 + $0x2d0] sm:$0xff] }
 0x42f   :  { %v1425_v27 = vadd.f32 %v1424_v26, %v1341_v23  ;;  %v1426_v28 = vpop.f32.mrb[2].mxu1 }
 0x430   :  { %v1429_v29 = vmax.f32 %v1423_v25, 0.0  ;;  %v1427_v30 = vpop.f32.mrb[3].mxu1  ;;  %v1550_v25 = vld [vmem:[#allocation14 + $0x3a8] sm:$0xff] }
 0x431   :  { %v1430_v31 = vmax.f32 %v1425_v27, 0.0  ;;  %v2802_v27 = vcombine.high %v1546_v24, %v1550_v25  ;;  %v1554_v28 = vld [vmem:[#allocation14 + $0x3c8] sm:$0xff]  ;;  %v2801_v30 = vcombine.low %v1546_v24, %v1550_v25  ;;  %v1539_v25 = vld [vmem:[#allocation14 + $0x350] sm:$0xff] }
 0x432   :  { %v3594_v35 = vpack.c.bf16 %v1429_v29, %v1429_v29  ;;  %v1558_v29 = vld [vmem:[#allocation14 + $0x3e8] sm:$0xff] }
 0x433   :  { %v3592_v34 = vpack.c.bf16 %v1430_v31, %v1430_v31  ;;  %v2810_v31 = vcombine.high %v1554_v28, %v1558_v29 }
 0x435   :  { %2275 = vmatprep.mubr.bf16.mxu1 %v3592_v34 }
 0x436   :  { %2276 = vmatmul.mubr.bf16.vlgmr.msra.gmra.mrb[4].mxu1 %v3594_v35 }
 0x437   :  { %2285 = vmatpush1.bf16.msra.mxu1 %v2689_v20  ;;  %2316 = vmatprep.mubr.bf16.mxu1 %v3592_v34  ;;  %v1538_v20 = vld [vmem:[#allocation14 + $0x348] sm:$0xff] }
 0x438   :  { %2286 = vmatprep.subr.bf16.mxu1 %v2698_v36  ;;  %v2794_v23 = vcombine.high %v1538_v20, %v1542_v21  ;;  %v2793_v26 = vcombine.low %v1538_v20, %v1542_v21  ;;  %v2809_v36 = vcombine.low %v1554_v28, %v1558_v29  ;;  %v1531_v21 = vld [vmem:[#allocation14 + $0x310] sm:$0xff] }
 0x439   :  { %v1547_v29 = vld [vmem:[#allocation14 + $0x390] sm:$0xff] }
 0x43b   :  { %2287 = vmatpush1.bf16.msra.mxu1 %v2697_v39  ;;  %v1447_v39 = vld [vmem:[#allocation14 + $0x70] sm:$0xff] }
 0x43c   :  { %2288 = vmatprep.subr.bf16.mxu1 %v2706_v40  ;;  %v2691_v40 = vcombine.low %v1435_v32, %v1439_v33  ;;  %v2700_v41 = vcombine.high %v1443_v38, %v1447_v39  ;;  %v1555_v33 = vld [vmem:[#allocation14 + $0x3d0] sm:$0xff] }
 0x43f   :  { %2289 = vmatpush1.bf16.msra.mxu1 %v2705_v43  ;;  %v1455_v43 = vld [vmem:[#allocation14 + $0xb0] sm:$0xff] }
 0x440   :  { %2290 = vmatprep.subr.bf16.mxu1 %v2714_v44  ;;  %v2699_v44 = vcombine.low %v1443_v38, %v1447_v39  ;;  %v2708_v45 = vcombine.high %v1451_v42, %v1455_v43  ;;  %v1436_v39 = vld [vmem:[#allocation14 + $0x18] sm:$0xff] }
 0x443   :  { %2291 = vmatpush1.bf16.msra.mxu1 %v2713_v47  ;;  %v1463_v47 = vld [vmem:[#allocation14 + $0xf0] sm:$0xff] }
 0x444   :  { %2292 = vmatprep.subr.bf16.mxu1 %v2722_v48  ;;  %v2707_v48 = vcombine.low %v1451_v42, %v1455_v43  ;;  %v2716_v50 = vcombine.high %v1459_v46, %v1463_v47  ;;  %v1444_v43 = vld [vmem:[#allocation14 + $0x58] sm:$0xff] }
 0x447   :  { %2293 = vmatpush1.bf16.msra.mxu1 %v2721_v53  ;;  %v1471_v53 = vld [vmem:[#allocation14 + $0x130] sm:$0xff] }
 0x448   :  { %2294 = vmatprep.subr.bf16.mxu1 %v2730_v54  ;;  %v2715_v54 = vcombine.low %v1459_v46, %v1463_v47  ;;  %v2724_v55 = vcombine.high %v1467_v52, %v1471_v53  ;;  %v1452_v47 = vld [vmem:[#allocation14 + $0x98] sm:$0xff] }
 0x44b   :  { %2295 = vmatpush1.bf16.msra.mxu1 %v2729_v57  ;;  %v1479_v57 = vld [vmem:[#allocation14 + $0x170] sm:$0xff] }
 0x44c   :  { %2296 = vmatprep.subr.bf16.mxu1 %v2738_v58  ;;  %v2723_v58 = vcombine.low %v1467_v52, %v1471_v53  ;;  %v2732_v59 = vcombine.high %v1475_v56, %v1479_v57  ;;  %v1460_v53 = vld [vmem:[#allocation14 + $0xd8] sm:$0xff] }
 0x44f   :  { %2297 = vmatpush1.bf16.msra.mxu1 %v2737_v61  ;;  %v1487_v61 = vld [vmem:[#allocation14 + $0x1b0] sm:$0xff] }
 0x450   :  { %2298 = vmatprep.subr.bf16.mxu1 %v2746_v16  ;;  %v2731_v16 = vcombine.low %v1475_v56, %v1479_v57  ;;  %v2740_v62 = vcombine.high %v1483_v60, %v1487_v61  ;;  %v1468_v57 = vld [vmem:[#allocation14 + $0x118] sm:$0xff] }
 0x453   :  { %2299 = vmatpush1.bf16.msra.mxu1 %v2745_v0  ;;  %v1495_v0 = vld [vmem:[#allocation14 + $0x1f0] sm:$0xff] }
 0x454   :  { %2300 = vmatprep.subr.bf16.mxu1 %v2754_v1  ;;  %v2739_v1 = vcombine.low %v1483_v60, %v1487_v61  ;;  %v2748_v2 = vcombine.high %v1491_v63, %v1495_v0  ;;  %v1476_v61 = vld [vmem:[#allocation14 + $0x158] sm:$0xff] }
 0x457   :  { %2301 = vmatpush1.bf16.msra.mxu1 %v2753_v4  ;;  %v1503_v4 = vld [vmem:[#allocation14 + $0x230] sm:$0xff] }
 0x458   :  { %2302 = vmatprep.subr.bf16.mxu1 %v2762_v5  ;;  %v2747_v5 = vcombine.low %v1491_v63, %v1495_v0  ;;  %v2756_v6 = vcombine.high %v1499_v3, %v1503_v4  ;;  %v1484_v63 = vld [vmem:[#allocation14 + $0x198] sm:$0xff] }
 0x459   :  { %v1488_v0 = vld [vmem:[#allocation14 + $0x1b8] sm:$0xff] }
 0x45b   :  { %2303 = vmatpush1.bf16.msra.mxu1 %v2761_v8  ;;  %v1511_v8 = vld [vmem:[#allocation14 + $0x270] sm:$0xff] }
 0x45c   :  { %2304 = vmatprep.subr.bf16.mxu1 %v2770_v9  ;;  %v2755_v9 = vcombine.low %v1499_v3, %v1503_v4  ;;  %v2764_v10 = vcombine.high %v1507_v7, %v1511_v8  ;;  %v1492_v3 = vld [vmem:[#allocation14 + $0x1d8] sm:$0xff] }
 0x45d   :  { %v1496_v4 = vld [vmem:[#allocation14 + $0x1f8] sm:$0xff] }
 0x45f   :  { %2305 = vmatpush1.bf16.msra.mxu1 %v2769_v12  ;;  %v1519_v12 = vld [vmem:[#allocation14 + $0x2b0] sm:$0xff] }
 0x460   :  { %2306 = vmatprep.subr.bf16.mxu1 %v2778_v14  ;;  %v2763_v14 = vcombine.low %v1507_v7, %v1511_v8  ;;  %v2772_v15 = vcombine.high %v1515_v11, %v1519_v12  ;;  %v1500_v7 = vld [vmem:[#allocation14 + $0x218] sm:$0xff] }
 0x461   :  { %v1504_v8 = vld [vmem:[#allocation14 + $0x238] sm:$0xff] }
 0x463   :  { %2307 = vmatpush1.bf16.msra.mxu1 %v2777_v18  ;;  %v1527_v18 = vld [vmem:[#allocation14 + $0x2f0] sm:$0xff] }
 0x464   :  { %2308 = vmatprep.subr.bf16.mxu1 %v2786_v19  ;;  %v2771_v19 = vcombine.low %v1515_v11, %v1519_v12  ;;  %v2780_v20 = vcombine.high %v1523_v17, %v1527_v18  ;;  %v1508_v11 = vld [vmem:[#allocation14 + $0x258] sm:$0xff] }
 0x465   :  { %v1512_v12 = vld [vmem:[#allocation14 + $0x278] sm:$0xff] }
 0x467   :  { %2309 = vmatpush1.bf16.msra.mxu1 %v2785_v22  ;;  %v1535_v22 = vld [vmem:[#allocation14 + $0x330] sm:$0xff] }
 0x468   :  { %2310 = vmatprep.subr.bf16.mxu1 %v2794_v23  ;;  %v2779_v23 = vcombine.low %v1523_v17, %v1527_v18  ;;  %v2788_v24 = vcombine.high %v1531_v21, %v1535_v22  ;;  %v1516_v17 = vld [vmem:[#allocation14 + $0x298] sm:$0xff] }
 0x469   :  { %v1520_v18 = vld [vmem:[#allocation14 + $0x2b8] sm:$0xff] }
 0x46b   :  { %2311 = vmatpush1.bf16.msra.mxu1 %v2793_v26  ;;  %v1543_v26 = vld [vmem:[#allocation14 + $0x370] sm:$0xff] }
 0x46c   :  { %2312 = vmatprep.subr.bf16.mxu1 %v2802_v27  ;;  %v2787_v27 = vcombine.low %v1531_v21, %v1535_v22  ;;  %v2796_v28 = vcombine.high %v1539_v25, %v1543_v26  ;;  %v1524_v21 = vld [vmem:[#allocation14 + $0x2d8] sm:$0xff] }
 0x46d   :  { %v1528_v22 = vld [vmem:[#allocation14 + $0x2f8] sm:$0xff] }
 0x46f   :  { %2313 = vmatpush1.bf16.msra.mxu1 %v2801_v30  ;;  %v1551_v30 = vld [vmem:[#allocation14 + $0x3b0] sm:$0xff] }
 0x470   :  { %2314 = vmatprep.subr.bf16.mxu1 %v2810_v31  ;;  %v2795_v31 = vcombine.low %v1539_v25, %v1543_v26  ;;  %v2804_v32 = vcombine.high %v1547_v29, %v1551_v30  ;;  %v1532_v25 = vld [vmem:[#allocation14 + $0x318] sm:$0xff] }
 0x471   :  { %v1536_v26 = vld [vmem:[#allocation14 + $0x338] sm:$0xff] }
 0x473   :  { %2315 = vmatpush1.bf16.msra.mxu1 %v2809_v36  ;;  %v1559_v36 = vld [vmem:[#allocation14 + $0x3f0] sm:$0xff] }
 0x474   :  { %2325 = vmatprep.subr.bf16.mxu1 %v2692_v37  ;;  %v2803_v37 = vcombine.low %v1547_v29, %v1551_v30  ;;  %v2812_v38 = vcombine.high %v1555_v33, %v1559_v36  ;;  %v1540_v29 = vld [vmem:[#allocation14 + $0x358] sm:$0xff] }
 0x475   :  { %v1544_v30 = vld [vmem:[#allocation14 + $0x378] sm:$0xff] }
 0x476   :  { %2317 = vmatmul.mubr.bf16.vlgmr.msra.gmra.mrb[8].mxu1 %v3594_v35 }
 0x477   :  { %2326 = vmatpush1.bf16.msra.mxu1 %v2691_v40  ;;  %2357 = vmatprep.mubr.bf16.mxu1 %v3592_v34  ;;  %v1440_v40 = vld [vmem:[#allocation14 + $0x38] sm:$0xff] }
 0x478   :  { %2327 = vmatprep.subr.bf16.mxu1 %v2700_v41  ;;  %v2811_v41 = vcombine.low %v1555_v33, %v1559_v36  ;;  %v2694_v42 = vcombine.high %v1436_v39, %v1440_v40  ;;  %v1548_v33 = vld [vmem:[#allocation14 + $0x398] sm:$0xff] }
 0x479   :  { %v1552_v36 = vld [vmem:[#allocation14 + $0x3b8] sm:$0xff] }
 0x47b   :  { %2328 = vmatpush1.bf16.msra.mxu1 %v2699_v44  ;;  %v1448_v44 = vld [vmem:[#allocation14 + $0x78] sm:$0xff] }
 0x47c   :  { %2329 = vmatprep.subr.bf16.mxu1 %v2708_v45  ;;  %v2693_v45 = vcombine.low %v1436_v39, %v1440_v40  ;;  %v2702_v46 = vcombine.high %v1444_v43, %v1448_v44  ;;  %v1556_v39 = vld [vmem:[#allocation14 + $0x3d8] sm:$0xff] }
 0x47d   :  { %v1560_v40 = vld [vmem:[#allocation14 + $0x3f8] sm:$0xff] }
 0x47f   :  { %2330 = vmatpush1.bf16.msra.mxu1 %v2707_v48  ;;  %v1456_v48 = vld [vmem:[#allocation14 + $0xb8] sm:$0xff] }
 0x480   :  { %2331 = vmatprep.subr.bf16.mxu1 %v2716_v50  ;;  %v2701_v50 = vcombine.low %v1444_v43, %v1448_v44  ;;  %v2710_v52 = vcombine.high %v1452_v47, %v1456_v48  ;;  %v2813_v43 = vcombine.low %v1556_v39, %v1560_v40  ;;  %v3604_v44 = vld [vmem:[#allocation16] sm:$0xff] }
 0x483   :  { %2332 = vmatpush1.bf16.msra.mxu1 %v2715_v54  ;;  %v1464_v54 = vld [vmem:[#allocation14 + $0xf8] sm:$0xff] }
 0x484   :  { %2333 = vmatprep.subr.bf16.mxu1 %v2724_v55  ;;  %v2709_v55 = vcombine.low %v1452_v47, %v1456_v48  ;;  %v2718_v56 = vcombine.high %v1460_v53, %v1464_v54 }
 0x487   :  { %2334 = vmatpush1.bf16.msra.mxu1 %v2723_v58  ;;  %v1472_v58 = vld [vmem:[#allocation14 + $0x138] sm:$0xff] }
 0x488   :  { %2335 = vmatprep.subr.bf16.mxu1 %v2732_v59  ;;  %v2717_v59 = vcombine.low %v1460_v53, %v1464_v54  ;;  %v2726_v60 = vcombine.high %v1468_v57, %v1472_v58 }
 0x48b   :  { %2336 = vmatpush1.bf16.msra.mxu1 %v2731_v16  ;;  %v1480_v16 = vld [vmem:[#allocation14 + $0x178] sm:$0xff] }
 0x48c   :  { %2337 = vmatprep.subr.bf16.mxu1 %v2740_v62  ;;  %v2725_v62 = vcombine.low %v1468_v57, %v1472_v58 }
 0x48f   :  { %2338 = vmatpush1.bf16.msra.mxu1 %v2739_v1  ;;  %v2733_v1 = vcombine.low %v1476_v61, %v1480_v16 }
 0x490   :  { %2339 = vmatprep.subr.bf16.mxu1 %v2748_v2  ;;  %v2742_v2 = vcombine.high %v1484_v63, %v1488_v0 }
 0x493   :  { %2340 = vmatpush1.bf16.msra.mxu1 %v2747_v5  ;;  %v2741_v5 = vcombine.low %v1484_v63, %v1488_v0 }
 0x494   :  { %2341 = vmatprep.subr.bf16.mxu1 %v2756_v6  ;;  %v2750_v6 = vcombine.high %v1492_v3, %v1496_v4 }
 0x497   :  { %2342 = vmatpush1.bf16.msra.mxu1 %v2755_v9  ;;  %v2749_v9 = vcombine.low %v1492_v3, %v1496_v4 }
 0x498   :  { %2343 = vmatprep.subr.bf16.mxu1 %v2764_v10  ;;  %v2758_v10 = vcombine.high %v1500_v7, %v1504_v8 }
 0x49b   :  { %2344 = vmatpush1.bf16.msra.mxu1 %v2763_v14  ;;  %v2757_v14 = vcombine.low %v1500_v7, %v1504_v8 }
 0x49c   :  { %2345 = vmatprep.subr.bf16.mxu1 %v2772_v15  ;;  %v2766_v15 = vcombine.high %v1508_v11, %v1512_v12 }
 0x49f   :  { %2346 = vmatpush1.bf16.msra.mxu1 %v2771_v19  ;;  %v2765_v19 = vcombine.low %v1508_v11, %v1512_v12 }
 0x4a0   :  { %2347 = vmatprep.subr.bf16.mxu1 %v2780_v20  ;;  %v2774_v20 = vcombine.high %v1516_v17, %v1520_v18 }
 0x4a3   :  { %2348 = vmatpush1.bf16.msra.mxu1 %v2779_v23  ;;  %v2773_v23 = vcombine.low %v1516_v17, %v1520_v18  ;;  %v3377_v17 = vmov 1966171168  }
 0x4a4   :  { %2349 = vmatprep.subr.bf16.mxu1 %v2788_v24  ;;  %v2782_v24 = vcombine.high %v1524_v21, %v1528_v22  ;;  %v2468_v18 = vunpack.c.l.s4 %v3377_v17 }
 0x4a7   :  { %2350 = vmatpush1.bf16.msra.mxu1 %v2787_v27  ;;  %v2781_v27 = vcombine.low %v1524_v21, %v1528_v22 }
 0x4a8   :  { %2351 = vmatprep.subr.bf16.mxu1 %v2796_v28  ;;  %v2790_v28 = vcombine.high %v1532_v25, %v1536_v26 }
 0x4ab   :  { %2352 = vmatpush1.bf16.msra.mxu1 %v2795_v31  ;;  %v2789_v31 = vcombine.low %v1532_v25, %v1536_v26 }
 0x4ac   :  { %2353 = vmatprep.subr.bf16.mxu1 %v2804_v32  ;;  %v2798_v32 = vcombine.high %v1540_v29, %v1544_v30 }
 0x4af   :  { %2354 = vmatpush1.bf16.msra.mxu1 %v2803_v37  ;;  %v2797_v37 = vcombine.low %v1540_v29, %v1544_v30 }
 0x4b0   :  { %2355 = vmatprep.subr.bf16.mxu1 %v2812_v38  ;;  %v2806_v38 = vcombine.high %v1548_v33, %v1552_v36 }
 0x4b3   :  { %2356 = vmatpush1.bf16.msra.mxu1 %v2811_v41  ;;  %v2805_v41 = vcombine.low %v1548_v33, %v1552_v36 }
 0x4b4   :  { %2366 = vmatprep.subr.bf16.mxu1 %v2694_v42  ;;  %v2814_v42 = vcombine.high %v1556_v39, %v1560_v40 }
 0x4b6   :  { %2358 = vmatmul.mubr.bf16.vlgmr.msra.gmra.mrb[12].mxu1 %v3594_v35 }
 0x4b7   :  { %2367 = vmatpush1.bf16.msra.mxu1 %v2693_v45  ;;  %2398 = vmatprep.mubr.bf16.mxu1 %v3592_v34  ;;  %v2734_v34 = vcombine.high %v1476_v61, %v1480_v16  ;;  %v1566_v45 = vrot.slane %v3604_v44, %v3583_v49 }
 0x4b8   :  { %2368 = vmatprep.subr.bf16.mxu1 %v2702_v46  ;;  %v1570_v46 = vrot.slane %v3604_v44, %v3586_v51 }
 0x4bb   :  { %2369 = vmatpush1.bf16.msra.mxu1 %v2701_v50 }
 0x4bc   :  { %2370 = vmatprep.subr.bf16.mxu1 %v2710_v52 }
 0x4bf   :  { %2371 = vmatpush1.bf16.msra.mxu1 %v2709_v55 }
 0x4c0   :  { %2372 = vmatprep.subr.bf16.mxu1 %v2718_v56 }
 0x4c3   :  { %2373 = vmatpush1.bf16.msra.mxu1 %v2717_v59 }
 0x4c4   :  { %2374 = vmatprep.subr.bf16.mxu1 %v2726_v60 }
 0x4c7   :  { %2375 = vmatpush1.bf16.msra.mxu1 %v2725_v62  ;;  %v1573_v62 = vsub.s32 2, %v3550_v13 }
 0x4c8   :  { %2376 = vmatprep.subr.bf16.mxu1 %v2734_v34  ;;  %v1577_v34 = vsub.s32 3, %v3550_v13 }
 0x4c9   :  { %v1574_v63 = vrot.slane %v3604_v44, %v1573_v62 }
 0x4ca   :  { %v1578_v0 = vrot.slane %v3604_v44, %v1577_v34 }
 0x4cb   :  { %2377 = vmatpush1.bf16.msra.mxu1 %v2733_v1 }
 0x4cc   :  { %2378 = vmatprep.subr.bf16.mxu1 %v2742_v2 }
 0x4cf   :  { %2379 = vmatpush1.bf16.msra.mxu1 %v2741_v5 }
 0x4d0   :  { %2380 = vmatprep.subr.bf16.mxu1 %v2750_v6 }
 0x4d3   :  { %2381 = vmatpush1.bf16.msra.mxu1 %v2749_v9 }
 0x4d4   :  { %2382 = vmatprep.subr.bf16.mxu1 %v2758_v10 }
 0x4d7   :  { %2383 = vmatpush1.bf16.msra.mxu1 %v2757_v14 }
 0x4d8   :  { %2384 = vmatprep.subr.bf16.mxu1 %v2766_v15 }
 0x4db   :  { %2385 = vmatpush1.bf16.msra.mxu1 %v2765_v19  ;;  %v2469_v19 = vunpack.c.0.s8 %v2468_v18 }
 0x4dc   :  { %2386 = vmatprep.subr.bf16.mxu1 %v2774_v20 }
 0x4dd   :  { %v2472_v21 = vsub.s32 %v2469_v19, %v3550_v13 }
 0x4df   :  { %2387 = vmatpush1.bf16.msra.mxu1 %v2773_v23 }
 0x4e0   :  { %2388 = vmatprep.subr.bf16.mxu1 %v2782_v24 }
 0x4e3   :  { %2389 = vmatpush1.bf16.msra.mxu1 %v2781_v27  ;;  %v1581_v27 = vsub.s32 4, %v3550_v13 }
 0x4e4   :  { %2390 = vmatprep.subr.bf16.mxu1 %v2790_v28  ;;  %v1585_v28 = vsub.s32 5, %v3550_v13 }
 0x4e5   :  { %v1582_v29 = vrot.slane %v3604_v44, %v1581_v27 }
 0x4e6   :  { %v1586_v30 = vrot.slane %v3604_v44, %v1585_v28 }
 0x4e7   :  { %2391 = vmatpush1.bf16.msra.mxu1 %v2789_v31 }
 0x4e8   :  { %2392 = vmatprep.subr.bf16.mxu1 %v2798_v32 }
 0x4eb   :  { %2393 = vmatpush1.bf16.msra.mxu1 %v2797_v37 }
 0x4ec   :  { %2394 = vmatprep.subr.bf16.mxu1 %v2806_v38 }
 0x4ef   :  { %2395 = vmatpush1.bf16.msra.mxu1 %v2805_v41 }
 0x4f0   :  { %2396 = vmatprep.subr.bf16.mxu1 %v2814_v42 }
 0x4f3   :  { %2397 = vmatpush1.bf16.msra.mxu1 %v2813_v43 }
 0x4f6   :  { %2399 = vmatmul.mubr.bf16.vlgmr.msra.gmra.mrb[16].mxu1 %v3594_v35 }
 0x509   :  { %v2277_v47 = vpop.f32.mrb[4].mxu1 }
 0x50a   :  { %v2278_v48 = vadd.f32 %v2277_v47, %v1566_v45  ;;  %v2279_v50 = vpop.f32.mrb[5].mxu1 }
 0x50b   :  { %v2280_v52 = vadd.f32 %v2279_v50, %v1570_v46  ;;  %v2281_v53 = vpop.f32.mrb[6].mxu1 }
 0x50c   :  { %v2407_v54 = vsub.f32 0.0, %v2278_v48  ;;  %v2282_v55 = vpop.f32.mrb[7].mxu1  ;;  %v1589_v53 = vsub.s32 6, %v3550_v13 }
 0x50d   :  { %v2408_v56 = vsub.f32 0.0, %v2280_v52 }
 0x50e   :  { %v2415_v57 = vmul.f32 1.442695, %v2407_v54  ;;  %v1593_v54 = vsub.s32 7, %v3550_v13  ;;  %v1590_v55 = vrot.slane %v3604_v44, %v1589_v53 }
 0x50f   :  { %v2417_v58 = vmul.f32 1.442695, %v2408_v56 }
 0x510   :  { %3096 = vpow2.f32 %v2415_v57  ;;  %v1594_v56 = vrot.slane %v3604_v44, %v1593_v54 }
 0x511   :  { %3098 = vpow2.f32 %v2417_v58 }
 0x51a   :  { %v3097_v35 = vpop.eup %3096 }
 0x51b   :  { %v3099_v59 = vpop.eup %3098  ;;  %v2431_v60 = vadd.f32 1.0, %v3097_v35 }
 0x51c   :  { %v2432_v61 = vadd.f32 1.0, %v3099_v59 }
 0x51d   :  { %3100 = vrcp.f32 %v2431_v60 }
 0x51e   :  { %3102 = vrcp.f32 %v2432_v61 }
 0x527   :  { %v3101_v49 = vpop.eup %3100 }
 0x528   :  { %v3103_v51 = vpop.eup %3102 }
 0x529   :  { %v2815_v16 = vpack.c.bf16 %v3103_v51, %v3101_v49 }
 0x52b   :  { %v2473_v24 = vrot.slane %v2815_v16, %v2472_v21 }
 0x549   :  { %v2318_v1 = vpop.f32.mrb[8].mxu1 }
 0x54a   :  { %v2319_v2 = vadd.f32 %v2318_v1, %v1574_v63  ;;  %v2320_v3 = vpop.f32.mrb[9].mxu1 }
 0x54b   :  { %v2321_v4 = vadd.f32 %v2320_v3, %v1578_v0  ;;  %v2322_v5 = vpop.f32.mrb[10].mxu1 }
 0x54c   :  { %v2409_v6 = vsub.f32 0.0, %v2319_v2  ;;  %v2323_v7 = vpop.f32.mrb[11].mxu1 }
 0x54d   :  { %v2410_v8 = vsub.f32 0.0, %v2321_v4 }
 0x54e   :  { %v2419_v9 = vmul.f32 1.442695, %v2409_v6 }
 0x54f   :  { %v2421_v10 = vmul.f32 1.442695, %v2410_v8 }
 0x550   :  { %3104 = vpow2.f32 %v2419_v9 }
 0x551   :  { %3106 = vpow2.f32 %v2421_v10 }
 0x55a   :  { %v3105_v11 = vpop.eup %3104 }
 0x55b   :  { %v3107_v12 = vpop.eup %3106  ;;  %v2433_v14 = vadd.f32 1.0, %v3105_v11 }
 0x55c   :  { %v2434_v15 = vadd.f32 1.0, %v3107_v12 }
 0x55d   :  { %3108 = vrcp.f32 %v2433_v14 }
 0x55e   :  { %3110 = vrcp.f32 %v2434_v15 }
 0x567   :  { %v3109_v20 = vpop.eup %3108 }
 0x568   :  { %v3111_v22 = vpop.eup %3110 }
 0x569   :  { %v2816_v23 = vpack.c.bf16 %v3111_v22, %v3109_v20 }
 0x56b   :  { %v2480_v25 = vrot.slane %v2816_v23, %v2472_v21 }
 0x56d   :  { %v2495_v26 = vcombine.low %v2473_v24, %v2480_v25 }
 0x56f   :  { %v2503_v6 = vrot.slane %v2495_v26, %v2472_v21 }
 0x589   :  { %v2359_v31 = vpop.f32.mrb[12].mxu1 }
 0x58a   :  { %v2360_v32 = vadd.f32 %v2359_v31, %v1582_v29  ;;  %v2361_v33 = vpop.f32.mrb[13].mxu1 }
 0x58b   :  { %v2362_v36 = vadd.f32 %v2361_v33, %v1586_v30  ;;  %v2363_v37 = vpop.f32.mrb[14].mxu1 }
 0x58c   :  { %v2411_v38 = vsub.f32 0.0, %v2360_v32  ;;  %v2364_v39 = vpop.f32.mrb[15].mxu1 }
 0x58d   :  { %v2412_v40 = vsub.f32 0.0, %v2362_v36 }
 0x58e   :  { %v2423_v41 = vmul.f32 1.442695, %v2411_v38 }
 0x58f   :  { %v2425_v42 = vmul.f32 1.442695, %v2412_v40 }
 0x590   :  { %3112 = vpow2.f32 %v2423_v41 }
 0x591   :  { %3114 = vpow2.f32 %v2425_v42 }
 0x59a   :  { %v3113_v43 = vpop.eup %3112 }
 0x59b   :  { %v3115_v45 = vpop.eup %3114  ;;  %v2435_v46 = vadd.f32 1.0, %v3113_v43 }
 0x59c   :  { %v2436_v47 = vadd.f32 1.0, %v3115_v45 }
 0x59d   :  { %3116 = vrcp.f32 %v2435_v46 }
 0x59e   :  { %3118 = vrcp.f32 %v2436_v47 }
 0x5a7   :  { %v3117_v48 = vpop.eup %3116 }
 0x5a8   :  { %v3119_v50 = vpop.eup %3118 }
 0x5a9   :  { %v2817_v52 = vpack.c.bf16 %v3119_v50, %v3117_v48 }
 0x5ab   :  { %v2487_v3 = vrot.slane %v2817_v52, %v2472_v21 }
 0x5c9   :  { %v2400_v57 = vpop.f32.mrb[16].mxu1 }
 0x5ca   :  { %v2401_v58 = vadd.f32 %v2400_v57, %v1590_v55  ;;  %v2402_v35 = vpop.f32.mrb[17].mxu1 }
 0x5cb   :  { %v2403_v59 = vadd.f32 %v2402_v35, %v1594_v56  ;;  %v2404_v60 = vpop.f32.mrb[18].mxu1 }
 0x5cc   :  { %v2413_v61 = vsub.f32 0.0, %v2401_v58  ;;  %v2405_v49 = vpop.f32.mrb[19].mxu1 }
 0x5cd   :  { %v2414_v51 = vsub.f32 0.0, %v2403_v59 }
 0x5ce   :  { %v2427_v16 = vmul.f32 1.442695, %v2413_v61 }
 0x5cf   :  { %v2429_v62 = vmul.f32 1.442695, %v2414_v51 }
 0x5d0   :  { %3120 = vpow2.f32 %v2427_v16 }
 0x5d1   :  { %3122 = vpow2.f32 %v2429_v62 }
 0x5da   :  { %v3121_v34 = vpop.eup %3120 }
 0x5db   :  { %v3123_v63 = vpop.eup %3122  ;;  %v2437_v0 = vadd.f32 1.0, %v3121_v34 }
 0x5dc   :  { %v2438_v13 = vadd.f32 1.0, %v3123_v63 }
 0x5dd   :  { %3124 = vrcp.f32 %v2437_v0 }
 0x5de   :  { %3126 = vrcp.f32 %v2438_v13 }
 0x5e7   :  { %v3125_v1 = vpop.eup %3124 }
 0x5e8   :  { %v3127_v44 = vpop.eup %3126 }
 0x5e9   :  { %v2818_v2 = vpack.c.bf16 %v3127_v44, %v3125_v1 }
 0x5eb   :  { %v2494_v4 = vrot.slane %v2818_v2, %v2472_v21 }
 0x5ed   :  { %v2496_v5 = vcombine.low %v2487_v3, %v2494_v4 }
 0x5ef   :  { %v2510_v7 = vrot.slane %v2496_v5, %v2472_v21 }
 0x5f1   :  { %v2511_v8 = vcombine.low %v2503_v6, %v2510_v7 }
 0x5f3   :  { %2513 = vst [vmem:[#allocation17] sm:$0xff] %v2511_v8 }
 0x5f4   :  { %3337 = shalt.err (!%p3334_p6)
}
 0x5f5   :  { %s3338_s23 = scalar_lea.hbm %s3644_s9, 128 }
 0x5f6   :  { %p3339_p7 = scmp.ne.s32.totalorder %s3644_s9, %s3338_s23  ;;  %p3342_p8 = scmp.lt.u32.totalorder %s3338_s23, %s3644_s9 }
 0x5f8   :  { %p3344_p9 = pnand %p3342_p8, %p3339_p7 }
 0x5fa   :  { %3347 = shalt.err (!%p3344_p9)
}
 0x5fb   :  { %2523 = dma.vmem_to_hbm [thread:$0]  %s2521_s28, 128, %s3644_s9, [#allocation4]  }
 0x5fc   :  { %3358 = dma.done.wait [#allocation4], 128  }
 0x5fd   :  { %3359 = vsyncadd [#allocation4], 4294967168 }
 0x5fe   :  { %2527 = vsyncpa [#allocation3], 1 }
 0x5ff   :  { %2528 = vsyncpa [#allocation6], 1 }
 0x600   :  { %2529 = vsyncpa [#allocation9], 1 }
 0x601   :  { %2530 = vsyncpa [#allocation12], 1 }
 0x602   :  { %2531 = vsyncpa [#allocation15], 1 }
 0x603   :  { %2532 = vsyncpa [#allocation4], 1 }

</bundles_post_ra>
